<compile_context>
chip_gen: v7x
topology: tpu7x:2x2x1
jax: 0.10.0
libtpu: 0.0.40
codegen_flags: <defaults>
</compile_context>

<pallas_src>
import functools

import jax
import jax.numpy as jnp
from jax.experimental import pallas as pl
from jax.experimental.pallas import tpu as pltpu


def _round_up(x, m):
    return (x + m - 1) // m * m


def _lstm_recurrence_kernel(gx_ref, whh_ref, out_ref, cn_ref, h_sc, c_sc, *,
                            t_block, seq_len):
    """Sequential LSTM recurrence over one (batch_block, t_block) block.

    gx_ref : (Bt, t_block, 4, H) f32   precomputed x@W_ih^T + b, per gate
    whh_ref: (4, H, H)           f32   per-gate W_hh^T (resident in VMEM)
    out_ref: (Bt, t_block, H)          hidden states for this time block
    cn_ref : (Bt, H)                   final cell state (written on last block)
    h_sc, c_sc: (Bt, H) f32 scratch    state carried across the time grid axis
    """
    tb = pl.program_id(1)

    # Zero-init state at the first time block (module passes no hidden state).
    @pl.when(tb == 0)
    def _():
        h_sc[...] = jnp.zeros_like(h_sc)
        c_sc[...] = jnp.zeros_like(c_sc)

    padded = (seq_len % t_block) != 0

    h_prev = h_sc[...]
    c_prev = c_sc[...]

    # Static inner loop over the time block (t_block is capped at 32, so the
    # fully-unrolled body stays small): all loads/stores use static indices ->
    # dense, unmasked VMEM access and no dynamic-slice lowering on the
    # sequential critical path.
    for s in range(t_block):
        i_g = jax.nn.sigmoid(
            gx_ref[:, s, 0, :]
            + jnp.dot(h_prev, whh_ref[0], preferred_element_type=jnp.float32))
        f_g = jax.nn.sigmoid(
            gx_ref[:, s, 1, :]
            + jnp.dot(h_prev, whh_ref[1], preferred_element_type=jnp.float32))
        g_g = jnp.tanh(
            gx_ref[:, s, 2, :]
            + jnp.dot(h_prev, whh_ref[2], preferred_element_type=jnp.float32))
        o_g = jax.nn.sigmoid(
            gx_ref[:, s, 3, :]
            + jnp.dot(h_prev, whh_ref[3], preferred_element_type=jnp.float32))

        c_t = f_g * c_prev + i_g * g_g
        h_t = o_g * jnp.tanh(c_t)

        if padded:
            # Padded (zero) tail steps must not advance the real state.
            valid = (tb * t_block + s) < seq_len
            h_t = jnp.where(valid, h_t, h_prev)
            c_t = jnp.where(valid, c_t, c_prev)

        out_ref[:, s, :] = h_t.astype(out_ref.dtype)
        h_prev, c_prev = h_t, c_t

    h_sc[...] = h_prev
    c_sc[...] = c_prev

    @pl.when(tb == pl.num_programs(1) - 1)
    def _():
        cn_ref[...] = c_prev.astype(cn_ref.dtype)


def lstm_encoder_forward(x, w_ih, w_hh, b_ih, b_hh, *,
                         t_block=None, batch_block=None):
    """x: (B, T, I) batch-first, like the PyTorch module.

    Returns (lstm_out, (h_n, c_n)):
      lstm_out: (B, T, H); h_n/c_n: (num_layers=1, B, H).
    """
    B, T, I = x.shape
    H = w_hh.shape[1]                       # w_hh: (4H, H)

    # ---- Phase 1 (outside the recurrence): input projection for ALL steps ----
    # One big matmul with the bias folded in; reshape to (B, T, 4, H) is a free
    # row-major reshape (gate index becomes its own dim -> no lane slicing of a
    # 4H-wide gate vector inside the kernel).
    gx = (jnp.dot(x.reshape(B * T, I).astype(jnp.float32),
                  jnp.transpose(w_ih).astype(jnp.float32),
                  preferred_element_type=jnp.float32)
          + (b_ih + b_hh).astype(jnp.float32))
    gx = gx.reshape(B, T, 4, H)

    # Per-gate recurrent weights, stacked: whh_t[k] = W_hh_k^T  (H, H).
    whh_t = jnp.transpose(w_hh.reshape(4, H, H), (0, 2, 1)).astype(jnp.float32)

    # ---- Time blocking (amortize per-grid-step overhead, dense writeback) ----
    if t_block is None:
        t_block = min(_round_up(T, 8), 32)     # multiple of 8 -> dense sublanes
    Tp = _round_up(T, t_block)
    if Tp != T:
        gx = jnp.pad(gx, ((0, 0), (0, Tp - T), (0, 0), (0, 0)))

    if batch_block is None:
        batch_block = B          # on v7x: set B//2 to shard batch over both TCs
    assert B % batch_block == 0
    # (8,128) tiling rule for the (batch_block, H) c_n output block:
    assert batch_block == B or batch_block % 8 == 0

    n_b = B // batch_block
    n_t = Tp // t_block

    kernel = functools.partial(_lstm_recurrence_kernel,
                               t_block=t_block, seq_len=T)

    # Rough VMEM budget (double-buffered blocks + resident weights + scratch).
    f32 = 4
    est = 2 * (batch_block * t_block * 4 * H * f32        # gx block
               + 4 * H * H * f32                          # W_hh^T (resident)
               + batch_block * t_block * H * x.dtype.itemsize
               + batch_block * H * x.dtype.itemsize) \
        + 2 * batch_block * H * f32                       # h/c scratch
    vmem_limit = int(min(max(2 * est, 32 * 1024 * 1024), 96 * 1024 * 1024))

    out, c_n = pl.pallas_call(
        kernel,
        out_shape=(
            jax.ShapeDtypeStruct((B, Tp, H), x.dtype),    # all hidden states
            jax.ShapeDtypeStruct((B, H), x.dtype),        # final cell state
        ),
        grid_spec=pltpu.PrefetchScalarGridSpec(
            num_scalar_prefetch=0,
            grid=(n_b, n_t),
            in_specs=[
                # gates_x block: batch-first, time indexed directly (no wrapper
                # transpose); last two dims (4, H) equal the full array dims.
                pl.BlockSpec((batch_block, t_block, 4, H),
                             lambda b, t: (b, t, 0, 0)),
                # per-gate W_hh^T: resident (constant index across the grid)
                pl.BlockSpec((4, H, H), lambda b, t: (0, 0, 0)),
            ],
            out_specs=[
                pl.BlockSpec((batch_block, t_block, H), lambda b, t: (b, t, 0)),
                pl.BlockSpec((batch_block, H), lambda b, t: (b, 0)),
            ],
            scratch_shapes=[
                pltpu.VMEM((batch_block, H), jnp.float32),   # h state
                pltpu.VMEM((batch_block, H), jnp.float32),   # c state
            ],
        ),
        compiler_params=pltpu.CompilerParams(
            # batch axis is independent (v7x megacore); recurrence is sequential
            dimension_semantics=("parallel", "arbitrary"),
            vmem_limit_bytes=vmem_limit,
        ),
    )(gx, whh_t)

    lstm_out = out[:, :T] if Tp != T else out
    h_n = lstm_out[:, T - 1]                       # last hidden state
    return lstm_out, (h_n[None], c_n[None])        # (num_layers=1, B, H)


def _reference_lstm(x, w_ih, w_hh, b_ih, b_hh):
    """Pure-JAX reference (PyTorch LSTM semantics, gate order i,f,g,o)."""
    B, T, I = x.shape
    H = w_hh.shape[1]
    b = (b_ih + b_hh).astype(jnp.float32)

    def step(carry, x_t):
        h, c = carry
        gates = x_t @ w_ih.T + h @ w_hh.T + b
        i_g = jax.nn.sigmoid(gates[:, 0 * H:1 * H])
        f_g = jax.nn.sigmoid(gates[:, 1 * H:2 * H])
        g_g = jnp.tanh(gates[:, 2 * H:3 * H])
        o_g = jax.nn.sigmoid(gates[:, 3 * H:4 * H])
        c_t = f_g * c + i_g * g_g
        h_t = o_g * jnp.tanh(c_t)
        return (h_t, c_t), h_t

    h0 = jnp.zeros((B, H), jnp.float32)
    c0 = jnp.zeros((B, H), jnp.float32)
    (h_n, c_n), outs = jax.lax.scan(step, (h0, c0), jnp.transpose(x, (1, 0, 2)))
    return jnp.transpose(outs, (1, 0, 2)), (h_n[None], c_n[None])


if __name__ == "__main__":
    batch, seq_len, input_size, hidden_size = 2, 8, 4, 32

    key = jax.random.PRNGKey(0)
    kx, k1, k2, k3, k4 = jax.random.split(key, 5)

    # nn.LSTM init scheme: U(-1/sqrt(H), 1/sqrt(H))
    bound = 1.0 / (hidden_size ** 0.5)
    w_ih = jax.random.uniform(k1, (4 * hidden_size, input_size), jnp.float32, -bound, bound)
    w_hh = jax.random.uniform(k2, (4 * hidden_size, hidden_size), jnp.float32, -bound, bound)
    b_ih = jax.random.uniform(k3, (4 * hidden_size,), jnp.float32, -bound, bound)
    b_hh = jax.random.uniform(k4, (4 * hidden_size,), jnp.float32, -bound, bound)

    x = jax.random.normal(kx, (batch, seq_len, input_size), jnp.float32)

    lstm_out, (h_n, c_n) = jax.block_until_ready(
        jax.jit(lstm_encoder_forward)(x, w_ih, w_hh, b_ih, b_hh))

    ref_out, (ref_h, ref_c) = _reference_lstm(x, w_ih, w_hh, b_ih, b_hh)

    assert lstm_out.shape == (batch, seq_len, hidden_size)
    assert h_n.shape == (1, batch, hidden_size) and c_n.shape == (1, batch, hidden_size)
    assert jnp.allclose(lstm_out, ref_out, atol=1e-5, rtol=1e-5)
    assert jnp.allclose(h_n, ref_h, atol=1e-5, rtol=1e-5)
    assert jnp.allclose(c_n, ref_c, atol=1e-5, rtol=1e-5)

    print("KERNEL_OK")
</pallas_src>

<mosaic_0001>
module attributes {stable_mosaic.version = 11 : i64} {
  func.func @_lstm_recurrence_kernel(%arg0: i32, %arg1: i32, %arg2: memref<2x8x4x32xf32, #tpu.memory_space<vmem>>, %arg3: memref<4x32x32xf32, #tpu.memory_space<vmem>>, %arg4: memref<2x8x32xf32, #tpu.memory_space<vmem>>, %arg5: memref<2x32xf32, #tpu.memory_space<vmem>>, %arg6: memref<2x32xf32, #tpu.memory_space<vmem>>, %arg7: memref<2x32xf32, #tpu.memory_space<vmem>>) attributes {dimension_semantics = [#tpu.dimension_semantics<parallel>, #tpu.dimension_semantics<arbitrary>], iteration_bounds = array<i64: 1, 1>, scalar_prefetch = 0 : i64, scratch_operands = 2 : i64, tpu.core_type = #tpu.core_type<tc>, window_params = [{transform_indices = @transform_0, window_bounds = array<i64: 2, 8, 4, 32>}, {pipeline_mode = #tpu.pipeline_mode<synchronous>, transform_indices = @transform_1, window_bounds = array<i64: 4, 32, 32>}, {transform_indices = @transform_2, window_bounds = array<i64: 2, 8, 32>}, {transform_indices = @transform_3, window_bounds = array<i64: 2, 32>}]} {
    %c0_i32 = arith.constant 0 : i32
    %0 = arith.cmpi eq, %arg1, %c0_i32 : i32
    %1 = arith.extui %0 : i1 to i32
    %c0_i32_0 = arith.constant 0 : i32
    %2 = arith.cmpi ne, %1, %c0_i32_0 : i32
    scf.if %2 {
      %cst_306 = arith.constant 0.000000e+00 : f32
      %394 = vector.broadcast %cst_306 : f32 to vector<2x32xf32>
      %c0_307 = arith.constant 0 : index
      %c0_308 = arith.constant 0 : index
      %395 = vector.load %arg6[%c0_307, %c0_308] : memref<2x32xf32, #tpu.memory_space<vmem>>, vector<2x32xf32>
      tpu.vector_store %arg6[%c0_307, %c0_308], %394 {strides = array<i32>} : memref<2x32xf32, #tpu.memory_space<vmem>>, vector<2x32xf32>,
      %cst_309 = arith.constant 0.000000e+00 : f32
      %396 = vector.broadcast %cst_309 : f32 to vector<2x32xf32>
      %c0_310 = arith.constant 0 : index
      %c0_311 = arith.constant 0 : index
      %397 = vector.load %arg7[%c0_310, %c0_311] : memref<2x32xf32, #tpu.memory_space<vmem>>, vector<2x32xf32>
      tpu.vector_store %arg7[%c0_310, %c0_311], %396 {strides = array<i32>} : memref<2x32xf32, #tpu.memory_space<vmem>>, vector<2x32xf32>,
    } else {
    }
    %c0 = arith.constant 0 : index
    %c0_1 = arith.constant 0 : index
    %3 = vector.load %arg6[%c0, %c0_1] : memref<2x32xf32, #tpu.memory_space<vmem>>, vector<2x32xf32>
    %c0_2 = arith.constant 0 : index
    %c0_3 = arith.constant 0 : index
    %4 = vector.load %arg7[%c0_2, %c0_3] : memref<2x32xf32, #tpu.memory_space<vmem>>, vector<2x32xf32>
    %c0_4 = arith.constant 0 : index
    %c0_5 = arith.constant 0 : index
    %c0_6 = arith.constant 0 : index
    %c0_7 = arith.constant 0 : index
    %5 = vector.load %arg2[%c0_4, %c0_5, %c0_6, %c0_7] : memref<2x8x4x32xf32, #tpu.memory_space<vmem>>, vector<2x1x1x32xf32>
    %6 = vector.shape_cast %5 : vector<2x1x1x32xf32> to vector<2x32xf32>
    %c0_8 = arith.constant 0 : index
    %c0_9 = arith.constant 0 : index
    %c0_10 = arith.constant 0 : index
    %7 = vector.load %arg3[%c0_8, %c0_9, %c0_10] : memref<4x32x32xf32, #tpu.memory_space<vmem>>, vector<1x32x32xf32>
    %8 = vector.shape_cast %7 : vector<1x32x32xf32> to vector<32x32xf32>
    %cst = arith.constant dense<0.000000e+00> : vector<2x32xf32>
    %9 = tpu.matmul %3, %8, %cst {dimension_numbers = #tpu.dot_dimension_numbers<[1], [0], [0], [1], [0, 0, 1, 1], [], []>} : vector<2x32xf32>, vector<32x32xf32>, vector<2x32xf32> -> vector<2x32xf32>
    %10 = arith.addf %6, %9 : vector<2x32xf32>
    %11 = arith.negf %10 : vector<2x32xf32>
    %12 = math.exp %11 : vector<2x32xf32>
    %cst_11 = arith.constant 1.000000e+00 : f32
    %13 = vector.broadcast %cst_11 : f32 to vector<2x32xf32>
    %14 = arith.addf %13, %12 : vector<2x32xf32>
    %15 = arith.divf %13, %14 : vector<2x32xf32>
    %c0_12 = arith.constant 0 : index
    %c0_13 = arith.constant 0 : index
    %c1 = arith.constant 1 : index
    %c0_14 = arith.constant 0 : index
    %16 = vector.load %arg2[%c0_12, %c0_13, %c1, %c0_14] : memref<2x8x4x32xf32, #tpu.memory_space<vmem>>, vector<2x1x1x32xf32>
    %17 = vector.shape_cast %16 : vector<2x1x1x32xf32> to vector<2x32xf32>
    %c1_15 = arith.constant 1 : index
    %c0_16 = arith.constant 0 : index
    %c0_17 = arith.constant 0 : index
    %18 = vector.load %arg3[%c1_15, %c0_16, %c0_17] : memref<4x32x32xf32, #tpu.memory_space<vmem>>, vector<1x32x32xf32>
    %19 = vector.shape_cast %18 : vector<1x32x32xf32> to vector<32x32xf32>
    %cst_18 = arith.constant dense<0.000000e+00> : vector<2x32xf32>
    %20 = tpu.matmul %3, %19, %cst_18 {dimension_numbers = #tpu.dot_dimension_numbers<[1], [0], [0], [1], [0, 0, 1, 1], [], []>} : vector<2x32xf32>, vector<32x32xf32>, vector<2x32xf32> -> vector<2x32xf32>
    %21 = arith.addf %17, %20 : vector<2x32xf32>
    %22 = arith.negf %21 : vector<2x32xf32>
    %23 = math.exp %22 : vector<2x32xf32>
    %cst_19 = arith.constant 1.000000e+00 : f32
    %24 = vector.broadcast %cst_19 : f32 to vector<2x32xf32>
    %25 = arith.addf %24, %23 : vector<2x32xf32>
    %26 = arith.divf %24, %25 : vector<2x32xf32>
    %c0_20 = arith.constant 0 : index
    %c0_21 = arith.constant 0 : index
    %c2 = arith.constant 2 : index
    %c0_22 = arith.constant 0 : index
    %27 = vector.load %arg2[%c0_20, %c0_21, %c2, %c0_22] : memref<2x8x4x32xf32, #tpu.memory_space<vmem>>, vector<2x1x1x32xf32>
    %28 = vector.shape_cast %27 : vector<2x1x1x32xf32> to vector<2x32xf32>
    %c2_23 = arith.constant 2 : index
    %c0_24 = arith.constant 0 : index
    %c0_25 = arith.constant 0 : index
    %29 = vector.load %arg3[%c2_23, %c0_24, %c0_25] : memref<4x32x32xf32, #tpu.memory_space<vmem>>, vector<1x32x32xf32>
    %30 = vector.shape_cast %29 : vector<1x32x32xf32> to vector<32x32xf32>
    %cst_26 = arith.constant dense<0.000000e+00> : vector<2x32xf32>
    %31 = tpu.matmul %3, %30, %cst_26 {dimension_numbers = #tpu.dot_dimension_numbers<[1], [0], [0], [1], [0, 0, 1, 1], [], []>} : vector<2x32xf32>, vector<32x32xf32>, vector<2x32xf32> -> vector<2x32xf32>
    %32 = arith.addf %28, %31 : vector<2x32xf32>
    %33 = math.tanh %32 : vector<2x32xf32>
    %c0_27 = arith.constant 0 : index
    %c0_28 = arith.constant 0 : index
    %c3 = arith.constant 3 : index
    %c0_29 = arith.constant 0 : index
    %34 = vector.load %arg2[%c0_27, %c0_28, %c3, %c0_29] : memref<2x8x4x32xf32, #tpu.memory_space<vmem>>, vector<2x1x1x32xf32>
    %35 = vector.shape_cast %34 : vector<2x1x1x32xf32> to vector<2x32xf32>
    %c3_30 = arith.constant 3 : index
    %c0_31 = arith.constant 0 : index
    %c0_32 = arith.constant 0 : index
    %36 = vector.load %arg3[%c3_30, %c0_31, %c0_32] : memref<4x32x32xf32, #tpu.memory_space<vmem>>, vector<1x32x32xf32>
    %37 = vector.shape_cast %36 : vector<1x32x32xf32> to vector<32x32xf32>
    %cst_33 = arith.constant dense<0.000000e+00> : vector<2x32xf32>
    %38 = tpu.matmul %3, %37, %cst_33 {dimension_numbers = #tpu.dot_dimension_numbers<[1], [0], [0], [1], [0, 0, 1, 1], [], []>} : vector<2x32xf32>, vector<32x32xf32>, vector<2x32xf32> -> vector<2x32xf32>
    %39 = arith.addf %35, %38 : vector<2x32xf32>
    %40 = arith.negf %39 : vector<2x32xf32>
    %41 = math.exp %40 : vector<2x32xf32>
    %cst_34 = arith.constant 1.000000e+00 : f32
    %42 = vector.broadcast %cst_34 : f32 to vector<2x32xf32>
    %43 = arith.addf %42, %41 : vector<2x32xf32>
    %44 = arith.divf %42, %43 : vector<2x32xf32>
    %45 = arith.mulf %26, %4 : vector<2x32xf32>
    %46 = arith.mulf %15, %33 : vector<2x32xf32>
    %47 = arith.addf %45, %46 : vector<2x32xf32>
    %48 = math.tanh %47 : vector<2x32xf32>
    %49 = arith.mulf %44, %48 : vector<2x32xf32>
    %c0_35 = arith.constant 0 : index
    %c0_36 = arith.constant 0 : index
    %c0_37 = arith.constant 0 : index
    %50 = vector.load %arg4[%c0_35, %c0_36, %c0_37] : memref<2x8x32xf32, #tpu.memory_space<vmem>>, vector<2x1x32xf32>
    %51 = vector.shape_cast %50 : vector<2x1x32xf32> to vector<2x32xf32>
    %52 = vector.shape_cast %49 : vector<2x32xf32> to vector<2x1x32xf32>
    tpu.vector_store %arg4[%c0_35, %c0_36, %c0_37], %52 {strides = array<i32>} : memref<2x8x32xf32, #tpu.memory_space<vmem>>, vector<2x1x32xf32>,
    %c0_38 = arith.constant 0 : index
    %c1_39 = arith.constant 1 : index
    %c0_40 = arith.constant 0 : index
    %c0_41 = arith.constant 0 : index
    %53 = vector.load %arg2[%c0_38, %c1_39, %c0_40, %c0_41] : memref<2x8x4x32xf32, #tpu.memory_space<vmem>>, vector<2x1x1x32xf32>
    %54 = vector.shape_cast %53 : vector<2x1x1x32xf32> to vector<2x32xf32>
    %c0_42 = arith.constant 0 : index
    %c0_43 = arith.constant 0 : index
    %c0_44 = arith.constant 0 : index
    %55 = vector.load %arg3[%c0_42, %c0_43, %c0_44] : memref<4x32x32xf32, #tpu.memory_space<vmem>>, vector<1x32x32xf32>
    %56 = vector.shape_cast %55 : vector<1x32x32xf32> to vector<32x32xf32>
    %cst_45 = arith.constant dense<0.000000e+00> : vector<2x32xf32>
    %57 = tpu.matmul %49, %56, %cst_45 {dimension_numbers = #tpu.dot_dimension_numbers<[1], [0], [0], [1], [0, 0, 1, 1], [], []>} : vector<2x32xf32>, vector<32x32xf32>, vector<2x32xf32> -> vector<2x32xf32>
    %58 = arith.addf %54, %57 : vector<2x32xf32>
    %59 = arith.negf %58 : vector<2x32xf32>
    %60 = math.exp %59 : vector<2x32xf32>
    %cst_46 = arith.constant 1.000000e+00 : f32
    %61 = vector.broadcast %cst_46 : f32 to vector<2x32xf32>
    %62 = arith.addf %61, %60 : vector<2x32xf32>
    %63 = arith.divf %61, %62 : vector<2x32xf32>
    %c0_47 = arith.constant 0 : index
    %c1_48 = arith.constant 1 : index
    %c1_49 = arith.constant 1 : index
    %c0_50 = arith.constant 0 : index
    %64 = vector.load %arg2[%c0_47, %c1_48, %c1_49, %c0_50] : memref<2x8x4x32xf32, #tpu.memory_space<vmem>>, vector<2x1x1x32xf32>
    %65 = vector.shape_cast %64 : vector<2x1x1x32xf32> to vector<2x32xf32>
    %c1_51 = arith.constant 1 : index
    %c0_52 = arith.constant 0 : index
    %c0_53 = arith.constant 0 : index
    %66 = vector.load %arg3[%c1_51, %c0_52, %c0_53] : memref<4x32x32xf32, #tpu.memory_space<vmem>>, vector<1x32x32xf32>
    %67 = vector.shape_cast %66 : vector<1x32x32xf32> to vector<32x32xf32>
    %cst_54 = arith.constant dense<0.000000e+00> : vector<2x32xf32>
    %68 = tpu.matmul %49, %67, %cst_54 {dimension_numbers = #tpu.dot_dimension_numbers<[1], [0], [0], [1], [0, 0, 1, 1], [], []>} : vector<2x32xf32>, vector<32x32xf32>, vector<2x32xf32> -> vector<2x32xf32>
    %69 = arith.addf %65, %68 : vector<2x32xf32>
    %70 = arith.negf %69 : vector<2x32xf32>
    %71 = math.exp %70 : vector<2x32xf32>
    %cst_55 = arith.constant 1.000000e+00 : f32
    %72 = vector.broadcast %cst_55 : f32 to vector<2x32xf32>
    %73 = arith.addf %72, %71 : vector<2x32xf32>
    %74 = arith.divf %72, %73 : vector<2x32xf32>
    %c0_56 = arith.constant 0 : index
    %c1_57 = arith.constant 1 : index
    %c2_58 = arith.constant 2 : index
    %c0_59 = arith.constant 0 : index
    %75 = vector.load %arg2[%c0_56, %c1_57, %c2_58, %c0_59] : memref<2x8x4x32xf32, #tpu.memory_space<vmem>>, vector<2x1x1x32xf32>
    %76 = vector.shape_cast %75 : vector<2x1x1x32xf32> to vector<2x32xf32>
    %c2_60 = arith.constant 2 : index
    %c0_61 = arith.constant 0 : index
    %c0_62 = arith.constant 0 : index
    %77 = vector.load %arg3[%c2_60, %c0_61, %c0_62] : memref<4x32x32xf32, #tpu.memory_space<vmem>>, vector<1x32x32xf32>
    %78 = vector.shape_cast %77 : vector<1x32x32xf32> to vector<32x32xf32>
    %cst_63 = arith.constant dense<0.000000e+00> : vector<2x32xf32>
    %79 = tpu.matmul %49, %78, %cst_63 {dimension_numbers = #tpu.dot_dimension_numbers<[1], [0], [0], [1], [0, 0, 1, 1], [], []>} : vector<2x32xf32>, vector<32x32xf32>, vector<2x32xf32> -> vector<2x32xf32>
    %80 = arith.addf %76, %79 : vector<2x32xf32>
    %81 = math.tanh %80 : vector<2x32xf32>
    %c0_64 = arith.constant 0 : index
    %c1_65 = arith.constant 1 : index
    %c3_66 = arith.constant 3 : index
    %c0_67 = arith.constant 0 : index
    %82 = vector.load %arg2[%c0_64, %c1_65, %c3_66, %c0_67] : memref<2x8x4x32xf32, #tpu.memory_space<vmem>>, vector<2x1x1x32xf32>
    %83 = vector.shape_cast %82 : vector<2x1x1x32xf32> to vector<2x32xf32>
    %c3_68 = arith.constant 3 : index
    %c0_69 = arith.constant 0 : index
    %c0_70 = arith.constant 0 : index
    %84 = vector.load %arg3[%c3_68, %c0_69, %c0_70] : memref<4x32x32xf32, #tpu.memory_space<vmem>>, vector<1x32x32xf32>
    %85 = vector.shape_cast %84 : vector<1x32x32xf32> to vector<32x32xf32>
    %cst_71 = arith.constant dense<0.000000e+00> : vector<2x32xf32>
    %86 = tpu.matmul %49, %85, %cst_71 {dimension_numbers = #tpu.dot_dimension_numbers<[1], [0], [0], [1], [0, 0, 1, 1], [], []>} : vector<2x32xf32>, vector<32x32xf32>, vector<2x32xf32> -> vector<2x32xf32>
    %87 = arith.addf %83, %86 : vector<2x32xf32>
    %88 = arith.negf %87 : vector<2x32xf32>
    %89 = math.exp %88 : vector<2x32xf32>
    %cst_72 = arith.constant 1.000000e+00 : f32
    %90 = vector.broadcast %cst_72 : f32 to vector<2x32xf32>
    %91 = arith.addf %90, %89 : vector<2x32xf32>
    %92 = arith.divf %90, %91 : vector<2x32xf32>
    %93 = arith.mulf %74, %47 : vector<2x32xf32>
    %94 = arith.mulf %63, %81 : vector<2x32xf32>
    %95 = arith.addf %93, %94 : vector<2x32xf32>
    %96 = math.tanh %95 : vector<2x32xf32>
    %97 = arith.mulf %92, %96 : vector<2x32xf32>
    %c0_73 = arith.constant 0 : index
    %c1_74 = arith.constant 1 : index
    %c0_75 = arith.constant 0 : index
    %98 = vector.load %arg4[%c0_73, %c1_74, %c0_75] : memref<2x8x32xf32, #tpu.memory_space<vmem>>, vector<2x1x32xf32>
    %99 = vector.shape_cast %98 : vector<2x1x32xf32> to vector<2x32xf32>
    %100 = vector.shape_cast %97 : vector<2x32xf32> to vector<2x1x32xf32>
    tpu.vector_store %arg4[%c0_73, %c1_74, %c0_75], %100 {strides = array<i32>} : memref<2x8x32xf32, #tpu.memory_space<vmem>>, vector<2x1x32xf32>,
    %c0_76 = arith.constant 0 : index
    %c2_77 = arith.constant 2 : index
    %c0_78 = arith.constant 0 : index
    %c0_79 = arith.constant 0 : index
    %101 = vector.load %arg2[%c0_76, %c2_77, %c0_78, %c0_79] : memref<2x8x4x32xf32, #tpu.memory_space<vmem>>, vector<2x1x1x32xf32>
    %102 = vector.shape_cast %101 : vector<2x1x1x32xf32> to vector<2x32xf32>
    %c0_80 = arith.constant 0 : index
    %c0_81 = arith.constant 0 : index
    %c0_82 = arith.constant 0 : index
    %103 = vector.load %arg3[%c0_80, %c0_81, %c0_82] : memref<4x32x32xf32, #tpu.memory_space<vmem>>, vector<1x32x32xf32>
    %104 = vector.shape_cast %103 : vector<1x32x32xf32> to vector<32x32xf32>
    %cst_83 = arith.constant dense<0.000000e+00> : vector<2x32xf32>
    %105 = tpu.matmul %97, %104, %cst_83 {dimension_numbers = #tpu.dot_dimension_numbers<[1], [0], [0], [1], [0, 0, 1, 1], [], []>} : vector<2x32xf32>, vector<32x32xf32>, vector<2x32xf32> -> vector<2x32xf32>
    %106 = arith.addf %102, %105 : vector<2x32xf32>
    %107 = arith.negf %106 : vector<2x32xf32>
    %108 = math.exp %107 : vector<2x32xf32>
    %cst_84 = arith.constant 1.000000e+00 : f32
    %109 = vector.broadcast %cst_84 : f32 to vector<2x32xf32>
    %110 = arith.addf %109, %108 : vector<2x32xf32>
    %111 = arith.divf %109, %110 : vector<2x32xf32>
    %c0_85 = arith.constant 0 : index
    %c2_86 = arith.constant 2 : index
    %c1_87 = arith.constant 1 : index
    %c0_88 = arith.constant 0 : index
    %112 = vector.load %arg2[%c0_85, %c2_86, %c1_87, %c0_88] : memref<2x8x4x32xf32, #tpu.memory_space<vmem>>, vector<2x1x1x32xf32>
    %113 = vector.shape_cast %112 : vector<2x1x1x32xf32> to vector<2x32xf32>
    %c1_89 = arith.constant 1 : index
    %c0_90 = arith.constant 0 : index
    %c0_91 = arith.constant 0 : index
    %114 = vector.load %arg3[%c1_89, %c0_90, %c0_91] : memref<4x32x32xf32, #tpu.memory_space<vmem>>, vector<1x32x32xf32>
    %115 = vector.shape_cast %114 : vector<1x32x32xf32> to vector<32x32xf32>
    %cst_92 = arith.constant dense<0.000000e+00> : vector<2x32xf32>
    %116 = tpu.matmul %97, %115, %cst_92 {dimension_numbers = #tpu.dot_dimension_numbers<[1], [0], [0], [1], [0, 0, 1, 1], [], []>} : vector<2x32xf32>, vector<32x32xf32>, vector<2x32xf32> -> vector<2x32xf32>
    %117 = arith.addf %113, %116 : vector<2x32xf32>
    %118 = arith.negf %117 : vector<2x32xf32>
    %119 = math.exp %118 : vector<2x32xf32>
    %cst_93 = arith.constant 1.000000e+00 : f32
    %120 = vector.broadcast %cst_93 : f32 to vector<2x32xf32>
    %121 = arith.addf %120, %119 : vector<2x32xf32>
    %122 = arith.divf %120, %121 : vector<2x32xf32>
    %c0_94 = arith.constant 0 : index
    %c2_95 = arith.constant 2 : index
    %c2_96 = arith.constant 2 : index
    %c0_97 = arith.constant 0 : index
    %123 = vector.load %arg2[%c0_94, %c2_95, %c2_96, %c0_97] : memref<2x8x4x32xf32, #tpu.memory_space<vmem>>, vector<2x1x1x32xf32>
    %124 = vector.shape_cast %123 : vector<2x1x1x32xf32> to vector<2x32xf32>
    %c2_98 = arith.constant 2 : index
    %c0_99 = arith.constant 0 : index
    %c0_100 = arith.constant 0 : index
    %125 = vector.load %arg3[%c2_98, %c0_99, %c0_100] : memref<4x32x32xf32, #tpu.memory_space<vmem>>, vector<1x32x32xf32>
    %126 = vector.shape_cast %125 : vector<1x32x32xf32> to vector<32x32xf32>
    %cst_101 = arith.constant dense<0.000000e+00> : vector<2x32xf32>
    %127 = tpu.matmul %97, %126, %cst_101 {dimension_numbers = #tpu.dot_dimension_numbers<[1], [0], [0], [1], [0, 0, 1, 1], [], []>} : vector<2x32xf32>, vector<32x32xf32>, vector<2x32xf32> -> vector<2x32xf32>
    %128 = arith.addf %124, %127 : vector<2x32xf32>
    %129 = math.tanh %128 : vector<2x32xf32>
    %c0_102 = arith.constant 0 : index
    %c2_103 = arith.constant 2 : index
    %c3_104 = arith.constant 3 : index
    %c0_105 = arith.constant 0 : index
    %130 = vector.load %arg2[%c0_102, %c2_103, %c3_104, %c0_105] : memref<2x8x4x32xf32, #tpu.memory_space<vmem>>, vector<2x1x1x32xf32>
    %131 = vector.shape_cast %130 : vector<2x1x1x32xf32> to vector<2x32xf32>
    %c3_106 = arith.constant 3 : index
    %c0_107 = arith.constant 0 : index
    %c0_108 = arith.constant 0 : index
    %132 = vector.load %arg3[%c3_106, %c0_107, %c0_108] : memref<4x32x32xf32, #tpu.memory_space<vmem>>, vector<1x32x32xf32>
    %133 = vector.shape_cast %132 : vector<1x32x32xf32> to vector<32x32xf32>
    %cst_109 = arith.constant dense<0.000000e+00> : vector<2x32xf32>
    %134 = tpu.matmul %97, %133, %cst_109 {dimension_numbers = #tpu.dot_dimension_numbers<[1], [0], [0], [1], [0, 0, 1, 1], [], []>} : vector<2x32xf32>, vector<32x32xf32>, vector<2x32xf32> -> vector<2x32xf32>
    %135 = arith.addf %131, %134 : vector<2x32xf32>
    %136 = arith.negf %135 : vector<2x32xf32>
    %137 = math.exp %136 : vector<2x32xf32>
    %cst_110 = arith.constant 1.000000e+00 : f32
    %138 = vector.broadcast %cst_110 : f32 to vector<2x32xf32>
    %139 = arith.addf %138, %137 : vector<2x32xf32>
    %140 = arith.divf %138, %139 : vector<2x32xf32>
    %141 = arith.mulf %122, %95 : vector<2x32xf32>
    %142 = arith.mulf %111, %129 : vector<2x32xf32>
    %143 = arith.addf %141, %142 : vector<2x32xf32>
    %144 = math.tanh %143 : vector<2x32xf32>
    %145 = arith.mulf %140, %144 : vector<2x32xf32>
    %c0_111 = arith.constant 0 : index
    %c2_112 = arith.constant 2 : index
    %c0_113 = arith.constant 0 : index
    %146 = vector.load %arg4[%c0_111, %c2_112, %c0_113] : memref<2x8x32xf32, #tpu.memory_space<vmem>>, vector<2x1x32xf32>
    %147 = vector.shape_cast %146 : vector<2x1x32xf32> to vector<2x32xf32>
    %148 = vector.shape_cast %145 : vector<2x32xf32> to vector<2x1x32xf32>
    tpu.vector_store %arg4[%c0_111, %c2_112, %c0_113], %148 {strides = array<i32>} : memref<2x8x32xf32, #tpu.memory_space<vmem>>, vector<2x1x32xf32>,
    %c0_114 = arith.constant 0 : index
    %c3_115 = arith.constant 3 : index
    %c0_116 = arith.constant 0 : index
    %c0_117 = arith.constant 0 : index
    %149 = vector.load %arg2[%c0_114, %c3_115, %c0_116, %c0_117] : memref<2x8x4x32xf32, #tpu.memory_space<vmem>>, vector<2x1x1x32xf32>
    %150 = vector.shape_cast %149 : vector<2x1x1x32xf32> to vector<2x32xf32>
    %c0_118 = arith.constant 0 : index
    %c0_119 = arith.constant 0 : index
    %c0_120 = arith.constant 0 : index
    %151 = vector.load %arg3[%c0_118, %c0_119, %c0_120] : memref<4x32x32xf32, #tpu.memory_space<vmem>>, vector<1x32x32xf32>
    %152 = vector.shape_cast %151 : vector<1x32x32xf32> to vector<32x32xf32>
    %cst_121 = arith.constant dense<0.000000e+00> : vector<2x32xf32>
    %153 = tpu.matmul %145, %152, %cst_121 {dimension_numbers = #tpu.dot_dimension_numbers<[1], [0], [0], [1], [0, 0, 1, 1], [], []>} : vector<2x32xf32>, vector<32x32xf32>, vector<2x32xf32> -> vector<2x32xf32>
    %154 = arith.addf %150, %153 : vector<2x32xf32>
    %155 = arith.negf %154 : vector<2x32xf32>
    %156 = math.exp %155 : vector<2x32xf32>
    %cst_122 = arith.constant 1.000000e+00 : f32
    %157 = vector.broadcast %cst_122 : f32 to vector<2x32xf32>
    %158 = arith.addf %157, %156 : vector<2x32xf32>
    %159 = arith.divf %157, %158 : vector<2x32xf32>
    %c0_123 = arith.constant 0 : index
    %c3_124 = arith.constant 3 : index
    %c1_125 = arith.constant 1 : index
    %c0_126 = arith.constant 0 : index
    %160 = vector.load %arg2[%c0_123, %c3_124, %c1_125, %c0_126] : memref<2x8x4x32xf32, #tpu.memory_space<vmem>>, vector<2x1x1x32xf32>
    %161 = vector.shape_cast %160 : vector<2x1x1x32xf32> to vector<2x32xf32>
    %c1_127 = arith.constant 1 : index
    %c0_128 = arith.constant 0 : index
    %c0_129 = arith.constant 0 : index
    %162 = vector.load %arg3[%c1_127, %c0_128, %c0_129] : memref<4x32x32xf32, #tpu.memory_space<vmem>>, vector<1x32x32xf32>
    %163 = vector.shape_cast %162 : vector<1x32x32xf32> to vector<32x32xf32>
    %cst_130 = arith.constant dense<0.000000e+00> : vector<2x32xf32>
    %164 = tpu.matmul %145, %163, %cst_130 {dimension_numbers = #tpu.dot_dimension_numbers<[1], [0], [0], [1], [0, 0, 1, 1], [], []>} : vector<2x32xf32>, vector<32x32xf32>, vector<2x32xf32> -> vector<2x32xf32>
    %165 = arith.addf %161, %164 : vector<2x32xf32>
    %166 = arith.negf %165 : vector<2x32xf32>
    %167 = math.exp %166 : vector<2x32xf32>
    %cst_131 = arith.constant 1.000000e+00 : f32
    %168 = vector.broadcast %cst_131 : f32 to vector<2x32xf32>
    %169 = arith.addf %168, %167 : vector<2x32xf32>
    %170 = arith.divf %168, %169 : vector<2x32xf32>
    %c0_132 = arith.constant 0 : index
    %c3_133 = arith.constant 3 : index
    %c2_134 = arith.constant 2 : index
    %c0_135 = arith.constant 0 : index
    %171 = vector.load %arg2[%c0_132, %c3_133, %c2_134, %c0_135] : memref<2x8x4x32xf32, #tpu.memory_space<vmem>>, vector<2x1x1x32xf32>
    %172 = vector.shape_cast %171 : vector<2x1x1x32xf32> to vector<2x32xf32>
    %c2_136 = arith.constant 2 : index
    %c0_137 = arith.constant 0 : index
    %c0_138 = arith.constant 0 : index
    %173 = vector.load %arg3[%c2_136, %c0_137, %c0_138] : memref<4x32x32xf32, #tpu.memory_space<vmem>>, vector<1x32x32xf32>
    %174 = vector.shape_cast %173 : vector<1x32x32xf32> to vector<32x32xf32>
    %cst_139 = arith.constant dense<0.000000e+00> : vector<2x32xf32>
    %175 = tpu.matmul %145, %174, %cst_139 {dimension_numbers = #tpu.dot_dimension_numbers<[1], [0], [0], [1], [0, 0, 1, 1], [], []>} : vector<2x32xf32>, vector<32x32xf32>, vector<2x32xf32> -> vector<2x32xf32>
    %176 = arith.addf %172, %175 : vector<2x32xf32>
    %177 = math.tanh %176 : vector<2x32xf32>
    %c0_140 = arith.constant 0 : index
    %c3_141 = arith.constant 3 : index
    %c3_142 = arith.constant 3 : index
    %c0_143 = arith.constant 0 : index
    %178 = vector.load %arg2[%c0_140, %c3_141, %c3_142, %c0_143] : memref<2x8x4x32xf32, #tpu.memory_space<vmem>>, vector<2x1x1x32xf32>
    %179 = vector.shape_cast %178 : vector<2x1x1x32xf32> to vector<2x32xf32>
    %c3_144 = arith.constant 3 : index
    %c0_145 = arith.constant 0 : index
    %c0_146 = arith.constant 0 : index
    %180 = vector.load %arg3[%c3_144, %c0_145, %c0_146] : memref<4x32x32xf32, #tpu.memory_space<vmem>>, vector<1x32x32xf32>
    %181 = vector.shape_cast %180 : vector<1x32x32xf32> to vector<32x32xf32>
    %cst_147 = arith.constant dense<0.000000e+00> : vector<2x32xf32>
    %182 = tpu.matmul %145, %181, %cst_147 {dimension_numbers = #tpu.dot_dimension_numbers<[1], [0], [0], [1], [0, 0, 1, 1], [], []>} : vector<2x32xf32>, vector<32x32xf32>, vector<2x32xf32> -> vector<2x32xf32>
    %183 = arith.addf %179, %182 : vector<2x32xf32>
    %184 = arith.negf %183 : vector<2x32xf32>
    %185 = math.exp %184 : vector<2x32xf32>
    %cst_148 = arith.constant 1.000000e+00 : f32
    %186 = vector.broadcast %cst_148 : f32 to vector<2x32xf32>
    %187 = arith.addf %186, %185 : vector<2x32xf32>
    %188 = arith.divf %186, %187 : vector<2x32xf32>
    %189 = arith.mulf %170, %143 : vector<2x32xf32>
    %190 = arith.mulf %159, %177 : vector<2x32xf32>
    %191 = arith.addf %189, %190 : vector<2x32xf32>
    %192 = math.tanh %191 : vector<2x32xf32>
    %193 = arith.mulf %188, %192 : vector<2x32xf32>
    %c0_149 = arith.constant 0 : index
    %c3_150 = arith.constant 3 : index
    %c0_151 = arith.constant 0 : index
    %194 = vector.load %arg4[%c0_149, %c3_150, %c0_151] : memref<2x8x32xf32, #tpu.memory_space<vmem>>, vector<2x1x32xf32>
    %195 = vector.shape_cast %194 : vector<2x1x32xf32> to vector<2x32xf32>
    %196 = vector.shape_cast %193 : vector<2x32xf32> to vector<2x1x32xf32>
    tpu.vector_store %arg4[%c0_149, %c3_150, %c0_151], %196 {strides = array<i32>} : memref<2x8x32xf32, #tpu.memory_space<vmem>>, vector<2x1x32xf32>,
    %c0_152 = arith.constant 0 : index
    %c4 = arith.constant 4 : index
    %c0_153 = arith.constant 0 : index
    %c0_154 = arith.constant 0 : index
    %197 = vector.load %arg2[%c0_152, %c4, %c0_153, %c0_154] : memref<2x8x4x32xf32, #tpu.memory_space<vmem>>, vector<2x1x1x32xf32>
    %198 = vector.shape_cast %197 : vector<2x1x1x32xf32> to vector<2x32xf32>
    %c0_155 = arith.constant 0 : index
    %c0_156 = arith.constant 0 : index
    %c0_157 = arith.constant 0 : index
    %199 = vector.load %arg3[%c0_155, %c0_156, %c0_157] : memref<4x32x32xf32, #tpu.memory_space<vmem>>, vector<1x32x32xf32>
    %200 = vector.shape_cast %199 : vector<1x32x32xf32> to vector<32x32xf32>
    %cst_158 = arith.constant dense<0.000000e+00> : vector<2x32xf32>
    %201 = tpu.matmul %193, %200, %cst_158 {dimension_numbers = #tpu.dot_dimension_numbers<[1], [0], [0], [1], [0, 0, 1, 1], [], []>} : vector<2x32xf32>, vector<32x32xf32>, vector<2x32xf32> -> vector<2x32xf32>
    %202 = arith.addf %198, %201 : vector<2x32xf32>
    %203 = arith.negf %202 : vector<2x32xf32>
    %204 = math.exp %203 : vector<2x32xf32>
    %cst_159 = arith.constant 1.000000e+00 : f32
    %205 = vector.broadcast %cst_159 : f32 to vector<2x32xf32>
    %206 = arith.addf %205, %204 : vector<2x32xf32>
    %207 = arith.divf %205, %206 : vector<2x32xf32>
    %c0_160 = arith.constant 0 : index
    %c4_161 = arith.constant 4 : index
    %c1_162 = arith.constant 1 : index
    %c0_163 = arith.constant 0 : index
    %208 = vector.load %arg2[%c0_160, %c4_161, %c1_162, %c0_163] : memref<2x8x4x32xf32, #tpu.memory_space<vmem>>, vector<2x1x1x32xf32>
    %209 = vector.shape_cast %208 : vector<2x1x1x32xf32> to vector<2x32xf32>
    %c1_164 = arith.constant 1 : index
    %c0_165 = arith.constant 0 : index
    %c0_166 = arith.constant 0 : index
    %210 = vector.load %arg3[%c1_164, %c0_165, %c0_166] : memref<4x32x32xf32, #tpu.memory_space<vmem>>, vector<1x32x32xf32>
    %211 = vector.shape_cast %210 : vector<1x32x32xf32> to vector<32x32xf32>
    %cst_167 = arith.constant dense<0.000000e+00> : vector<2x32xf32>
    %212 = tpu.matmul %193, %211, %cst_167 {dimension_numbers = #tpu.dot_dimension_numbers<[1], [0], [0], [1], [0, 0, 1, 1], [], []>} : vector<2x32xf32>, vector<32x32xf32>, vector<2x32xf32> -> vector<2x32xf32>
    %213 = arith.addf %209, %212 : vector<2x32xf32>
    %214 = arith.negf %213 : vector<2x32xf32>
    %215 = math.exp %214 : vector<2x32xf32>
    %cst_168 = arith.constant 1.000000e+00 : f32
    %216 = vector.broadcast %cst_168 : f32 to vector<2x32xf32>
    %217 = arith.addf %216, %215 : vector<2x32xf32>
    %218 = arith.divf %216, %217 : vector<2x32xf32>
    %c0_169 = arith.constant 0 : index
    %c4_170 = arith.constant 4 : index
    %c2_171 = arith.constant 2 : index
    %c0_172 = arith.constant 0 : index
    %219 = vector.load %arg2[%c0_169, %c4_170, %c2_171, %c0_172] : memref<2x8x4x32xf32, #tpu.memory_space<vmem>>, vector<2x1x1x32xf32>
    %220 = vector.shape_cast %219 : vector<2x1x1x32xf32> to vector<2x32xf32>
    %c2_173 = arith.constant 2 : index
    %c0_174 = arith.constant 0 : index
    %c0_175 = arith.constant 0 : index
    %221 = vector.load %arg3[%c2_173, %c0_174, %c0_175] : memref<4x32x32xf32, #tpu.memory_space<vmem>>, vector<1x32x32xf32>
    %222 = vector.shape_cast %221 : vector<1x32x32xf32> to vector<32x32xf32>
    %cst_176 = arith.constant dense<0.000000e+00> : vector<2x32xf32>
    %223 = tpu.matmul %193, %222, %cst_176 {dimension_numbers = #tpu.dot_dimension_numbers<[1], [0], [0], [1], [0, 0, 1, 1], [], []>} : vector<2x32xf32>, vector<32x32xf32>, vector<2x32xf32> -> vector<2x32xf32>
    %224 = arith.addf %220, %223 : vector<2x32xf32>
    %225 = math.tanh %224 : vector<2x32xf32>
    %c0_177 = arith.constant 0 : index
    %c4_178 = arith.constant 4 : index
    %c3_179 = arith.constant 3 : index
    %c0_180 = arith.constant 0 : index
    %226 = vector.load %arg2[%c0_177, %c4_178, %c3_179, %c0_180] : memref<2x8x4x32xf32, #tpu.memory_space<vmem>>, vector<2x1x1x32xf32>
    %227 = vector.shape_cast %226 : vector<2x1x1x32xf32> to vector<2x32xf32>
    %c3_181 = arith.constant 3 : index
    %c0_182 = arith.constant 0 : index
    %c0_183 = arith.constant 0 : index
    %228 = vector.load %arg3[%c3_181, %c0_182, %c0_183] : memref<4x32x32xf32, #tpu.memory_space<vmem>>, vector<1x32x32xf32>
    %229 = vector.shape_cast %228 : vector<1x32x32xf32> to vector<32x32xf32>
    %cst_184 = arith.constant dense<0.000000e+00> : vector<2x32xf32>
    %230 = tpu.matmul %193, %229, %cst_184 {dimension_numbers = #tpu.dot_dimension_numbers<[1], [0], [0], [1], [0, 0, 1, 1], [], []>} : vector<2x32xf32>, vector<32x32xf32>, vector<2x32xf32> -> vector<2x32xf32>
    %231 = arith.addf %227, %230 : vector<2x32xf32>
    %232 = arith.negf %231 : vector<2x32xf32>
    %233 = math.exp %232 : vector<2x32xf32>
    %cst_185 = arith.constant 1.000000e+00 : f32
    %234 = vector.broadcast %cst_185 : f32 to vector<2x32xf32>
    %235 = arith.addf %234, %233 : vector<2x32xf32>
    %236 = arith.divf %234, %235 : vector<2x32xf32>
    %237 = arith.mulf %218, %191 : vector<2x32xf32>
    %238 = arith.mulf %207, %225 : vector<2x32xf32>
    %239 = arith.addf %237, %238 : vector<2x32xf32>
    %240 = math.tanh %239 : vector<2x32xf32>
    %241 = arith.mulf %236, %240 : vector<2x32xf32>
    %c0_186 = arith.constant 0 : index
    %c4_187 = arith.constant 4 : index
    %c0_188 = arith.constant 0 : index
    %242 = vector.load %arg4[%c0_186, %c4_187, %c0_188] : memref<2x8x32xf32, #tpu.memory_space<vmem>>, vector<2x1x32xf32>
    %243 = vector.shape_cast %242 : vector<2x1x32xf32> to vector<2x32xf32>
    %244 = vector.shape_cast %241 : vector<2x32xf32> to vector<2x1x32xf32>
    tpu.vector_store %arg4[%c0_186, %c4_187, %c0_188], %244 {strides = array<i32>} : memref<2x8x32xf32, #tpu.memory_space<vmem>>, vector<2x1x32xf32>,
    %c0_189 = arith.constant 0 : index
    %c5 = arith.constant 5 : index
    %c0_190 = arith.constant 0 : index
    %c0_191 = arith.constant 0 : index
    %245 = vector.load %arg2[%c0_189, %c5, %c0_190, %c0_191] : memref<2x8x4x32xf32, #tpu.memory_space<vmem>>, vector<2x1x1x32xf32>
    %246 = vector.shape_cast %245 : vector<2x1x1x32xf32> to vector<2x32xf32>
    %c0_192 = arith.constant 0 : index
    %c0_193 = arith.constant 0 : index
    %c0_194 = arith.constant 0 : index
    %247 = vector.load %arg3[%c0_192, %c0_193, %c0_194] : memref<4x32x32xf32, #tpu.memory_space<vmem>>, vector<1x32x32xf32>
    %248 = vector.shape_cast %247 : vector<1x32x32xf32> to vector<32x32xf32>
    %cst_195 = arith.constant dense<0.000000e+00> : vector<2x32xf32>
    %249 = tpu.matmul %241, %248, %cst_195 {dimension_numbers = #tpu.dot_dimension_numbers<[1], [0], [0], [1], [0, 0, 1, 1], [], []>} : vector<2x32xf32>, vector<32x32xf32>, vector<2x32xf32> -> vector<2x32xf32>
    %250 = arith.addf %246, %249 : vector<2x32xf32>
    %251 = arith.negf %250 : vector<2x32xf32>
    %252 = math.exp %251 : vector<2x32xf32>
    %cst_196 = arith.constant 1.000000e+00 : f32
    %253 = vector.broadcast %cst_196 : f32 to vector<2x32xf32>
    %254 = arith.addf %253, %252 : vector<2x32xf32>
    %255 = arith.divf %253, %254 : vector<2x32xf32>
    %c0_197 = arith.constant 0 : index
    %c5_198 = arith.constant 5 : index
    %c1_199 = arith.constant 1 : index
    %c0_200 = arith.constant 0 : index
    %256 = vector.load %arg2[%c0_197, %c5_198, %c1_199, %c0_200] : memref<2x8x4x32xf32, #tpu.memory_space<vmem>>, vector<2x1x1x32xf32>
    %257 = vector.shape_cast %256 : vector<2x1x1x32xf32> to vector<2x32xf32>
    %c1_201 = arith.constant 1 : index
    %c0_202 = arith.constant 0 : index
    %c0_203 = arith.constant 0 : index
    %258 = vector.load %arg3[%c1_201, %c0_202, %c0_203] : memref<4x32x32xf32, #tpu.memory_space<vmem>>, vector<1x32x32xf32>
    %259 = vector.shape_cast %258 : vector<1x32x32xf32> to vector<32x32xf32>
    %cst_204 = arith.constant dense<0.000000e+00> : vector<2x32xf32>
    %260 = tpu.matmul %241, %259, %cst_204 {dimension_numbers = #tpu.dot_dimension_numbers<[1], [0], [0], [1], [0, 0, 1, 1], [], []>} : vector<2x32xf32>, vector<32x32xf32>, vector<2x32xf32> -> vector<2x32xf32>
    %261 = arith.addf %257, %260 : vector<2x32xf32>
    %262 = arith.negf %261 : vector<2x32xf32>
    %263 = math.exp %262 : vector<2x32xf32>
    %cst_205 = arith.constant 1.000000e+00 : f32
    %264 = vector.broadcast %cst_205 : f32 to vector<2x32xf32>
    %265 = arith.addf %264, %263 : vector<2x32xf32>
    %266 = arith.divf %264, %265 : vector<2x32xf32>
    %c0_206 = arith.constant 0 : index
    %c5_207 = arith.constant 5 : index
    %c2_208 = arith.constant 2 : index
    %c0_209 = arith.constant 0 : index
    %267 = vector.load %arg2[%c0_206, %c5_207, %c2_208, %c0_209] : memref<2x8x4x32xf32, #tpu.memory_space<vmem>>, vector<2x1x1x32xf32>
    %268 = vector.shape_cast %267 : vector<2x1x1x32xf32> to vector<2x32xf32>
    %c2_210 = arith.constant 2 : index
    %c0_211 = arith.constant 0 : index
    %c0_212 = arith.constant 0 : index
    %269 = vector.load %arg3[%c2_210, %c0_211, %c0_212] : memref<4x32x32xf32, #tpu.memory_space<vmem>>, vector<1x32x32xf32>
    %270 = vector.shape_cast %269 : vector<1x32x32xf32> to vector<32x32xf32>
    %cst_213 = arith.constant dense<0.000000e+00> : vector<2x32xf32>
    %271 = tpu.matmul %241, %270, %cst_213 {dimension_numbers = #tpu.dot_dimension_numbers<[1], [0], [0], [1], [0, 0, 1, 1], [], []>} : vector<2x32xf32>, vector<32x32xf32>, vector<2x32xf32> -> vector<2x32xf32>
    %272 = arith.addf %268, %271 : vector<2x32xf32>
    %273 = math.tanh %272 : vector<2x32xf32>
    %c0_214 = arith.constant 0 : index
    %c5_215 = arith.constant 5 : index
    %c3_216 = arith.constant 3 : index
    %c0_217 = arith.constant 0 : index
    %274 = vector.load %arg2[%c0_214, %c5_215, %c3_216, %c0_217] : memref<2x8x4x32xf32, #tpu.memory_space<vmem>>, vector<2x1x1x32xf32>
    %275 = vector.shape_cast %274 : vector<2x1x1x32xf32> to vector<2x32xf32>
    %c3_218 = arith.constant 3 : index
    %c0_219 = arith.constant 0 : index
    %c0_220 = arith.constant 0 : index
    %276 = vector.load %arg3[%c3_218, %c0_219, %c0_220] : memref<4x32x32xf32, #tpu.memory_space<vmem>>, vector<1x32x32xf32>
    %277 = vector.shape_cast %276 : vector<1x32x32xf32> to vector<32x32xf32>
    %cst_221 = arith.constant dense<0.000000e+00> : vector<2x32xf32>
    %278 = tpu.matmul %241, %277, %cst_221 {dimension_numbers = #tpu.dot_dimension_numbers<[1], [0], [0], [1], [0, 0, 1, 1], [], []>} : vector<2x32xf32>, vector<32x32xf32>, vector<2x32xf32> -> vector<2x32xf32>
    %279 = arith.addf %275, %278 : vector<2x32xf32>
    %280 = arith.negf %279 : vector<2x32xf32>
    %281 = math.exp %280 : vector<2x32xf32>
    %cst_222 = arith.constant 1.000000e+00 : f32
    %282 = vector.broadcast %cst_222 : f32 to vector<2x32xf32>
    %283 = arith.addf %282, %281 : vector<2x32xf32>
    %284 = arith.divf %282, %283 : vector<2x32xf32>
    %285 = arith.mulf %266, %239 : vector<2x32xf32>
    %286 = arith.mulf %255, %273 : vector<2x32xf32>
    %287 = arith.addf %285, %286 : vector<2x32xf32>
    %288 = math.tanh %287 : vector<2x32xf32>
    %289 = arith.mulf %284, %288 : vector<2x32xf32>
    %c0_223 = arith.constant 0 : index
    %c5_224 = arith.constant 5 : index
    %c0_225 = arith.constant 0 : index
    %290 = vector.load %arg4[%c0_223, %c5_224, %c0_225] : memref<2x8x32xf32, #tpu.memory_space<vmem>>, vector<2x1x32xf32>
    %291 = vector.shape_cast %290 : vector<2x1x32xf32> to vector<2x32xf32>
    %292 = vector.shape_cast %289 : vector<2x32xf32> to vector<2x1x32xf32>
    tpu.vector_store %arg4[%c0_223, %c5_224, %c0_225], %292 {strides = array<i32>} : memref<2x8x32xf32, #tpu.memory_space<vmem>>, vector<2x1x32xf32>,
    %c0_226 = arith.constant 0 : index
    %c6 = arith.constant 6 : index
    %c0_227 = arith.constant 0 : index
    %c0_228 = arith.constant 0 : index
    %293 = vector.load %arg2[%c0_226, %c6, %c0_227, %c0_228] : memref<2x8x4x32xf32, #tpu.memory_space<vmem>>, vector<2x1x1x32xf32>
    %294 = vector.shape_cast %293 : vector<2x1x1x32xf32> to vector<2x32xf32>
    %c0_229 = arith.constant 0 : index
    %c0_230 = arith.constant 0 : index
    %c0_231 = arith.constant 0 : index
    %295 = vector.load %arg3[%c0_229, %c0_230, %c0_231] : memref<4x32x32xf32, #tpu.memory_space<vmem>>, vector<1x32x32xf32>
    %296 = vector.shape_cast %295 : vector<1x32x32xf32> to vector<32x32xf32>
    %cst_232 = arith.constant dense<0.000000e+00> : vector<2x32xf32>
    %297 = tpu.matmul %289, %296, %cst_232 {dimension_numbers = #tpu.dot_dimension_numbers<[1], [0], [0], [1], [0, 0, 1, 1], [], []>} : vector<2x32xf32>, vector<32x32xf32>, vector<2x32xf32> -> vector<2x32xf32>
    %298 = arith.addf %294, %297 : vector<2x32xf32>
    %299 = arith.negf %298 : vector<2x32xf32>
    %300 = math.exp %299 : vector<2x32xf32>
    %cst_233 = arith.constant 1.000000e+00 : f32
    %301 = vector.broadcast %cst_233 : f32 to vector<2x32xf32>
    %302 = arith.addf %301, %300 : vector<2x32xf32>
    %303 = arith.divf %301, %302 : vector<2x32xf32>
    %c0_234 = arith.constant 0 : index
    %c6_235 = arith.constant 6 : index
    %c1_236 = arith.constant 1 : index
    %c0_237 = arith.constant 0 : index
    %304 = vector.load %arg2[%c0_234, %c6_235, %c1_236, %c0_237] : memref<2x8x4x32xf32, #tpu.memory_space<vmem>>, vector<2x1x1x32xf32>
    %305 = vector.shape_cast %304 : vector<2x1x1x32xf32> to vector<2x32xf32>
    %c1_238 = arith.constant 1 : index
    %c0_239 = arith.constant 0 : index
    %c0_240 = arith.constant 0 : index
    %306 = vector.load %arg3[%c1_238, %c0_239, %c0_240] : memref<4x32x32xf32, #tpu.memory_space<vmem>>, vector<1x32x32xf32>
    %307 = vector.shape_cast %306 : vector<1x32x32xf32> to vector<32x32xf32>
    %cst_241 = arith.constant dense<0.000000e+00> : vector<2x32xf32>
    %308 = tpu.matmul %289, %307, %cst_241 {dimension_numbers = #tpu.dot_dimension_numbers<[1], [0], [0], [1], [0, 0, 1, 1], [], []>} : vector<2x32xf32>, vector<32x32xf32>, vector<2x32xf32> -> vector<2x32xf32>
    %309 = arith.addf %305, %308 : vector<2x32xf32>
    %310 = arith.negf %309 : vector<2x32xf32>
    %311 = math.exp %310 : vector<2x32xf32>
    %cst_242 = arith.constant 1.000000e+00 : f32
    %312 = vector.broadcast %cst_242 : f32 to vector<2x32xf32>
    %313 = arith.addf %312, %311 : vector<2x32xf32>
    %314 = arith.divf %312, %313 : vector<2x32xf32>
    %c0_243 = arith.constant 0 : index
    %c6_244 = arith.constant 6 : index
    %c2_245 = arith.constant 2 : index
    %c0_246 = arith.constant 0 : index
    %315 = vector.load %arg2[%c0_243, %c6_244, %c2_245, %c0_246] : memref<2x8x4x32xf32, #tpu.memory_space<vmem>>, vector<2x1x1x32xf32>
    %316 = vector.shape_cast %315 : vector<2x1x1x32xf32> to vector<2x32xf32>
    %c2_247 = arith.constant 2 : index
    %c0_248 = arith.constant 0 : index
    %c0_249 = arith.constant 0 : index
    %317 = vector.load %arg3[%c2_247, %c0_248, %c0_249] : memref<4x32x32xf32, #tpu.memory_space<vmem>>, vector<1x32x32xf32>
    %318 = vector.shape_cast %317 : vector<1x32x32xf32> to vector<32x32xf32>
    %cst_250 = arith.constant dense<0.000000e+00> : vector<2x32xf32>
    %319 = tpu.matmul %289, %318, %cst_250 {dimension_numbers = #tpu.dot_dimension_numbers<[1], [0], [0], [1], [0, 0, 1, 1], [], []>} : vector<2x32xf32>, vector<32x32xf32>, vector<2x32xf32> -> vector<2x32xf32>
    %320 = arith.addf %316, %319 : vector<2x32xf32>
    %321 = math.tanh %320 : vector<2x32xf32>
    %c0_251 = arith.constant 0 : index
    %c6_252 = arith.constant 6 : index
    %c3_253 = arith.constant 3 : index
    %c0_254 = arith.constant 0 : index
    %322 = vector.load %arg2[%c0_251, %c6_252, %c3_253, %c0_254] : memref<2x8x4x32xf32, #tpu.memory_space<vmem>>, vector<2x1x1x32xf32>
    %323 = vector.shape_cast %322 : vector<2x1x1x32xf32> to vector<2x32xf32>
    %c3_255 = arith.constant 3 : index
    %c0_256 = arith.constant 0 : index
    %c0_257 = arith.constant 0 : index
    %324 = vector.load %arg3[%c3_255, %c0_256, %c0_257] : memref<4x32x32xf32, #tpu.memory_space<vmem>>, vector<1x32x32xf32>
    %325 = vector.shape_cast %324 : vector<1x32x32xf32> to vector<32x32xf32>
    %cst_258 = arith.constant dense<0.000000e+00> : vector<2x32xf32>
    %326 = tpu.matmul %289, %325, %cst_258 {dimension_numbers = #tpu.dot_dimension_numbers<[1], [0], [0], [1], [0, 0, 1, 1], [], []>} : vector<2x32xf32>, vector<32x32xf32>, vector<2x32xf32> -> vector<2x32xf32>
    %327 = arith.addf %323, %326 : vector<2x32xf32>
    %328 = arith.negf %327 : vector<2x32xf32>
    %329 = math.exp %328 : vector<2x32xf32>
    %cst_259 = arith.constant 1.000000e+00 : f32
    %330 = vector.broadcast %cst_259 : f32 to vector<2x32xf32>
    %331 = arith.addf %330, %329 : vector<2x32xf32>
    %332 = arith.divf %330, %331 : vector<2x32xf32>
    %333 = arith.mulf %314, %287 : vector<2x32xf32>
    %334 = arith.mulf %303, %321 : vector<2x32xf32>
    %335 = arith.addf %333, %334 : vector<2x32xf32>
    %336 = math.tanh %335 : vector<2x32xf32>
    %337 = arith.mulf %332, %336 : vector<2x32xf32>
    %c0_260 = arith.constant 0 : index
    %c6_261 = arith.constant 6 : index
    %c0_262 = arith.constant 0 : index
    %338 = vector.load %arg4[%c0_260, %c6_261, %c0_262] : memref<2x8x32xf32, #tpu.memory_space<vmem>>, vector<2x1x32xf32>
    %339 = vector.shape_cast %338 : vector<2x1x32xf32> to vector<2x32xf32>
    %340 = vector.shape_cast %337 : vector<2x32xf32> to vector<2x1x32xf32>
    tpu.vector_store %arg4[%c0_260, %c6_261, %c0_262], %340 {strides = array<i32>} : memref<2x8x32xf32, #tpu.memory_space<vmem>>, vector<2x1x32xf32>,
    %c0_263 = arith.constant 0 : index
    %c7 = arith.constant 7 : index
    %c0_264 = arith.constant 0 : index
    %c0_265 = arith.constant 0 : index
    %341 = vector.load %arg2[%c0_263, %c7, %c0_264, %c0_265] : memref<2x8x4x32xf32, #tpu.memory_space<vmem>>, vector<2x1x1x32xf32>
    %342 = vector.shape_cast %341 : vector<2x1x1x32xf32> to vector<2x32xf32>
    %c0_266 = arith.constant 0 : index
    %c0_267 = arith.constant 0 : index
    %c0_268 = arith.constant 0 : index
    %343 = vector.load %arg3[%c0_266, %c0_267, %c0_268] : memref<4x32x32xf32, #tpu.memory_space<vmem>>, vector<1x32x32xf32>
    %344 = vector.shape_cast %343 : vector<1x32x32xf32> to vector<32x32xf32>
    %cst_269 = arith.constant dense<0.000000e+00> : vector<2x32xf32>
    %345 = tpu.matmul %337, %344, %cst_269 {dimension_numbers = #tpu.dot_dimension_numbers<[1], [0], [0], [1], [0, 0, 1, 1], [], []>} : vector<2x32xf32>, vector<32x32xf32>, vector<2x32xf32> -> vector<2x32xf32>
    %346 = arith.addf %342, %345 : vector<2x32xf32>
    %347 = arith.negf %346 : vector<2x32xf32>
    %348 = math.exp %347 : vector<2x32xf32>
    %cst_270 = arith.constant 1.000000e+00 : f32
    %349 = vector.broadcast %cst_270 : f32 to vector<2x32xf32>
    %350 = arith.addf %349, %348 : vector<2x32xf32>
    %351 = arith.divf %349, %350 : vector<2x32xf32>
    %c0_271 = arith.constant 0 : index
    %c7_272 = arith.constant 7 : index
    %c1_273 = arith.constant 1 : index
    %c0_274 = arith.constant 0 : index
    %352 = vector.load %arg2[%c0_271, %c7_272, %c1_273, %c0_274] : memref<2x8x4x32xf32, #tpu.memory_space<vmem>>, vector<2x1x1x32xf32>
    %353 = vector.shape_cast %352 : vector<2x1x1x32xf32> to vector<2x32xf32>
    %c1_275 = arith.constant 1 : index
    %c0_276 = arith.constant 0 : index
    %c0_277 = arith.constant 0 : index
    %354 = vector.load %arg3[%c1_275, %c0_276, %c0_277] : memref<4x32x32xf32, #tpu.memory_space<vmem>>, vector<1x32x32xf32>
    %355 = vector.shape_cast %354 : vector<1x32x32xf32> to vector<32x32xf32>
    %cst_278 = arith.constant dense<0.000000e+00> : vector<2x32xf32>
    %356 = tpu.matmul %337, %355, %cst_278 {dimension_numbers = #tpu.dot_dimension_numbers<[1], [0], [0], [1], [0, 0, 1, 1], [], []>} : vector<2x32xf32>, vector<32x32xf32>, vector<2x32xf32> -> vector<2x32xf32>
    %357 = arith.addf %353, %356 : vector<2x32xf32>
    %358 = arith.negf %357 : vector<2x32xf32>
    %359 = math.exp %358 : vector<2x32xf32>
    %cst_279 = arith.constant 1.000000e+00 : f32
    %360 = vector.broadcast %cst_279 : f32 to vector<2x32xf32>
    %361 = arith.addf %360, %359 : vector<2x32xf32>
    %362 = arith.divf %360, %361 : vector<2x32xf32>
    %c0_280 = arith.constant 0 : index
    %c7_281 = arith.constant 7 : index
    %c2_282 = arith.constant 2 : index
    %c0_283 = arith.constant 0 : index
    %363 = vector.load %arg2[%c0_280, %c7_281, %c2_282, %c0_283] : memref<2x8x4x32xf32, #tpu.memory_space<vmem>>, vector<2x1x1x32xf32>
    %364 = vector.shape_cast %363 : vector<2x1x1x32xf32> to vector<2x32xf32>
    %c2_284 = arith.constant 2 : index
    %c0_285 = arith.constant 0 : index
    %c0_286 = arith.constant 0 : index
    %365 = vector.load %arg3[%c2_284, %c0_285, %c0_286] : memref<4x32x32xf32, #tpu.memory_space<vmem>>, vector<1x32x32xf32>
    %366 = vector.shape_cast %365 : vector<1x32x32xf32> to vector<32x32xf32>
    %cst_287 = arith.constant dense<0.000000e+00> : vector<2x32xf32>
    %367 = tpu.matmul %337, %366, %cst_287 {dimension_numbers = #tpu.dot_dimension_numbers<[1], [0], [0], [1], [0, 0, 1, 1], [], []>} : vector<2x32xf32>, vector<32x32xf32>, vector<2x32xf32> -> vector<2x32xf32>
    %368 = arith.addf %364, %367 : vector<2x32xf32>
    %369 = math.tanh %368 : vector<2x32xf32>
    %c0_288 = arith.constant 0 : index
    %c7_289 = arith.constant 7 : index
    %c3_290 = arith.constant 3 : index
    %c0_291 = arith.constant 0 : index
    %370 = vector.load %arg2[%c0_288, %c7_289, %c3_290, %c0_291] : memref<2x8x4x32xf32, #tpu.memory_space<vmem>>, vector<2x1x1x32xf32>
    %371 = vector.shape_cast %370 : vector<2x1x1x32xf32> to vector<2x32xf32>
    %c3_292 = arith.constant 3 : index
    %c0_293 = arith.constant 0 : index
    %c0_294 = arith.constant 0 : index
    %372 = vector.load %arg3[%c3_292, %c0_293, %c0_294] : memref<4x32x32xf32, #tpu.memory_space<vmem>>, vector<1x32x32xf32>
    %373 = vector.shape_cast %372 : vector<1x32x32xf32> to vector<32x32xf32>
    %cst_295 = arith.constant dense<0.000000e+00> : vector<2x32xf32>
    %374 = tpu.matmul %337, %373, %cst_295 {dimension_numbers = #tpu.dot_dimension_numbers<[1], [0], [0], [1], [0, 0, 1, 1], [], []>} : vector<2x32xf32>, vector<32x32xf32>, vector<2x32xf32> -> vector<2x32xf32>
    %375 = arith.addf %371, %374 : vector<2x32xf32>
    %376 = arith.negf %375 : vector<2x32xf32>
    %377 = math.exp %376 : vector<2x32xf32>
    %cst_296 = arith.constant 1.000000e+00 : f32
    %378 = vector.broadcast %cst_296 : f32 to vector<2x32xf32>
    %379 = arith.addf %378, %377 : vector<2x32xf32>
    %380 = arith.divf %378, %379 : vector<2x32xf32>
    %381 = arith.mulf %362, %335 : vector<2x32xf32>
    %382 = arith.mulf %351, %369 : vector<2x32xf32>
    %383 = arith.addf %381, %382 : vector<2x32xf32>
    %384 = math.tanh %383 : vector<2x32xf32>
    %385 = arith.mulf %380, %384 : vector<2x32xf32>
    %c0_297 = arith.constant 0 : index
    %c7_298 = arith.constant 7 : index
    %c0_299 = arith.constant 0 : index
    %386 = vector.load %arg4[%c0_297, %c7_298, %c0_299] : memref<2x8x32xf32, #tpu.memory_space<vmem>>, vector<2x1x32xf32>
    %387 = vector.shape_cast %386 : vector<2x1x32xf32> to vector<2x32xf32>
    %388 = vector.shape_cast %385 : vector<2x32xf32> to vector<2x1x32xf32>
    tpu.vector_store %arg4[%c0_297, %c7_298, %c0_299], %388 {strides = array<i32>} : memref<2x8x32xf32, #tpu.memory_space<vmem>>, vector<2x1x32xf32>,
    %c0_300 = arith.constant 0 : index
    %c0_301 = arith.constant 0 : index
    %389 = vector.load %arg6[%c0_300, %c0_301] : memref<2x32xf32, #tpu.memory_space<vmem>>, vector<2x32xf32>
    tpu.vector_store %arg6[%c0_300, %c0_301], %385 {strides = array<i32>} : memref<2x32xf32, #tpu.memory_space<vmem>>, vector<2x32xf32>,
    %c0_302 = arith.constant 0 : index
    %c0_303 = arith.constant 0 : index
    %390 = vector.load %arg7[%c0_302, %c0_303] : memref<2x32xf32, #tpu.memory_space<vmem>>, vector<2x32xf32>
    tpu.vector_store %arg7[%c0_302, %c0_303], %383 {strides = array<i32>} : memref<2x32xf32, #tpu.memory_space<vmem>>, vector<2x32xf32>,
    %c0_i32_304 = arith.constant 0 : i32
    %391 = arith.cmpi eq, %arg1, %c0_i32_304 : i32
    %392 = arith.extui %391 : i1 to i32
    %c0_i32_305 = arith.constant 0 : i32
    %393 = arith.cmpi ne, %392, %c0_i32_305 : i32
    scf.if %393 {
      %c0_306 = arith.constant 0 : index
      %c0_307 = arith.constant 0 : index
      %394 = vector.load %arg5[%c0_306, %c0_307] : memref<2x32xf32, #tpu.memory_space<vmem>>, vector<2x32xf32>
      tpu.vector_store %arg5[%c0_306, %c0_307], %383 {strides = array<i32>} : memref<2x32xf32, #tpu.memory_space<vmem>>, vector<2x32xf32>,
    } else {
    }
    return
  }
  func.func @transform_0(%arg0: i32, %arg1: i32) -> (i32, i32, i32, i32) {
    %c0_i32 = arith.constant 0 : i32
    %c0_i32_0 = arith.constant 0 : i32
    %c0_i32_1 = arith.constant 0 : i32
    return %arg0, %arg1, %c0_i32, %c0_i32_0 : i32, i32, i32, i32
  }
  func.func @transform_1(%arg0: i32, %arg1: i32) -> (i32, i32, i32) {
    %c0_i32 = arith.constant 0 : i32
    %c0_i32_0 = arith.constant 0 : i32
    %c0_i32_1 = arith.constant 0 : i32
    %c0_i32_2 = arith.constant 0 : i32
    return %c0_i32, %c0_i32_0, %c0_i32_1 : i32, i32, i32
  }
  func.func @transform_2(%arg0: i32, %arg1: i32) -> (i32, i32, i32) {
    %c0_i32 = arith.constant 0 : i32
    %c0_i32_0 = arith.constant 0 : i32
    return %arg0, %arg1, %c0_i32 : i32, i32, i32
  }
  func.func @transform_3(%arg0: i32, %arg1: i32) -> (i32, i32) {
    %c0_i32 = arith.constant 0 : i32
    %c0_i32_0 = arith.constant 0 : i32
    return %arg0, %c0_i32 : i32, i32
  }
}

</mosaic_0001>

<bundles_post_ra>
// kernel: lstm_encoder_forward.1
= control target key start
LH: loop header
LB: loop body
LE: loop exit
PB: predicated region body
PF: predicated region fallthrough
CT: control target
= control target key end

     0   :  { %v4364_v3 = vmov 0.0|0.0   ;;  %vm18_vm0 = vcmask 254976   ;;  %vm4365_vm1 = vmmov 0   ;;  %v4366_v11 = vmov 0.0   ;;  %s5080_s0 = inlined_call_operand.vmem [shape: f32[2,8,4,32], index: 0, kind: input, shape index: {}]   ;;  %s5081_s1 = inlined_call_operand.vmem [shape: f32[4,32,32], index: 1, kind: input, shape index: {}]   ;;  %s5082_s2 = inlined_call_operand.vmem [shape: f32[2,8,32], index: 2, kind: output, shape index: {0}]   ;;  %s5083_s3 = inlined_call_operand.hbm [shape: f32[2,32], index: 3, kind: output, shape index: {1}]  }
   0x1   :  { %v25_v0 = vld [vmem:[%s5081_s1] sm:$0xff]  ;;  %v26_v1 = vld [vmem:[%s5081_s1 + $0x8] sm:$0xff]  ;;  %3888 = vmatprep.subr.bf16.mxu0 %v4364_v3  ;;  %3894 = vmatprep.subr.bf16.mxu1 %v4364_v3  ;;  %v27_v6 = vld [vmem:[%s5081_s1 + $0x10] sm:$0xff]  ;;  %19 = vst.msk [vmem:[#allocation2] sm:$0x3] %vm18_vm0, %v4366_v11 }
   0x2   :  { %v3147_v2 = vld [vmem:[%s5081_s1 + $0x20] sm:$0xff]  ;;  %v4399_v4 = vpack.c.bf16 %v26_v1, %v25_v0  ;;  %v3148_v5 = vld [vmem:[%s5081_s1 + $0x28] sm:$0xff]  ;;  %v28_v7 = vld [vmem:[%s5081_s1 + $0x18] sm:$0xff]  ;;  %3544 = vmatprep.mubr.msk.f32.mxu0 %vm4365_vm1, %v4366_v11  ;;  %3555 = vmatprep.mubr.msk.f32.mxu1 %vm4365_vm1, %v4366_v11  ;;  %20 = vst.msk [vmem:[#allocation3] sm:$0x3] %vm18_vm0, %v4366_v11 }
   0x3   :  { %v4410_v8 = vpack.c.bf16 %v3148_v5, %v3147_v2  ;;  %v3149_v9 = vld [vmem:[%s5081_s1 + $0x30] sm:$0xff]  ;;  %v3150_v10 = vld [vmem:[%s5081_s1 + $0x38] sm:$0xff]  ;;  %v4427_v12 = vpack.c.bf16 %v28_v7, %v27_v6  ;;  %v3154_v14 = vld [vmem:[%s5081_s1 + $0x40] sm:$0xff] }
   0x4   :  { %3890 = vmatpush3.bf16.msra.mxu0 %v4399_v4  ;;  %v4431_v13 = vpack.c.bf16 %v3150_v10, %v3149_v9  ;;  %v3155_v15 = vld [vmem:[%s5081_s1 + $0x48] sm:$0xff]  ;;  %v3159_v16 = vld [vmem:[%s5081_s1 + $0x60] sm:$0xff] }
   0x5   :  { %3896 = vmatpush3.bf16.msra.mxu1 %v4410_v8  ;;  %3891 = vmatprep.subr.bf16.mxu0 %v4364_v3  ;;  %v3160_v17 = vld [vmem:[%s5081_s1 + $0x68] sm:$0xff] }
   0x6   :  { %3897 = vmatprep.subr.bf16.mxu1 %v4364_v3 }
   0x7   :  { %9 = vsyncpa [#allocation5], 0  ;;  %vm29_vm2 = vcmask 261120   ;;  %v4447_v18 = vpack.c.bf16 %v3155_v15, %v3154_v14  ;;  %v4451_v19 = vpack.c.bf16 %v3160_v17, %v3159_v16  ;;  %v3156_v20 = vld [vmem:[%s5081_s1 + $0x50] sm:$0xff]  ;;  %v3157_v21 = vld [vmem:[%s5081_s1 + $0x58] sm:$0xff]  ;;  %vm410_vm3 = vcmask 253952  }
   0x8   :  { %3893 = vmatpush3.bf16.msra.mxu0 %v4427_v12  ;;  %v21_v22 = vld [vmem:[#allocation2] sm:$0x3]  ;;  %v3161_v23 = vld [vmem:[%s5081_s1 + $0x70] sm:$0xff]  ;;  %v3162_v24 = vld [vmem:[%s5081_s1 + $0x78] sm:$0xff]  ;;  %v4469_v25 = vpack.c.bf16 %v3157_v21, %v3156_v20  ;;  %vm423_vm4 = vcmask 1041409  }
   0x9   :  { %3899 = vmatpush3.bf16.msra.mxu1 %v4431_v13  ;;  %3900 = vmatprep.subr.bf16.mxu0 %v4364_v3  ;;  %v4473_v26 = vpack.c.bf16 %v3162_v24, %v3161_v23  ;;  %v23_v27 = vld [vmem:[%s5080_s0] sm:$0x1]  ;;  %v121_v28 = vld [vmem:[%s5080_s0 + $0x1] sm:$0x1]  ;;  %v216_v45 = vld [vmem:[%s5080_s0 + $0x2] sm:$0x1] }
   0xa   :  { %3906 = vmatprep.subr.bf16.mxu1 %v4364_v3  ;;  %v24_v29 = vld [vmem:[%s5080_s0 + $0x20] sm:$0x1]  ;;  %v122_v33 = vld [vmem:[%s5080_s0 + $0x21] sm:$0x1]  ;;  %v301_v46 = vld [vmem:[%s5080_s0 + $0x3] sm:$0x1] }
   0xb   :  { %3545 = vmatmul.mubr.msk.f32.vlgmr.msra.gmra.mrb[0].mxu0 %vm29_vm2, %v21_v22  ;;  %v302_v49 = vld [vmem:[%s5080_s0 + $0x23] sm:$0x1]  ;;  %v217_v52 = vld [vmem:[%s5080_s0 + $0x22] sm:$0x1] }
   0xc   :  { %3556 = vmatmul.mubr.msk.f32.vlgmr.msra.gmra.mrb[0].mxu1 %vm29_vm2, %v21_v22  ;;  %3902 = vmatpush3.bf16.msra.mxu0 %v4447_v18  ;;  %v22_v10 = vld [vmem:[#allocation3] sm:$0x3] }
   0xd   :  { %3908 = vmatpush3.bf16.msra.mxu1 %v4451_v19  ;;  %3903 = vmatprep.subr.bf16.mxu0 %v4364_v3  ;;  %v397_v17 = vrot.slane %v22_v10, 1 }
   0xe   :  { %3909 = vmatprep.subr.bf16.mxu1 %v4364_v3  ;;  %3566 = vmatprep.mubr.msk.f32.mxu0 %vm4365_vm1, %v4366_v11 }
   0xf   :  { %3577 = vmatprep.mubr.msk.f32.mxu1 %vm4365_vm1, %v4366_v11 }
  0x10   :  { %3905 = vmatpush3.bf16.msra.mxu0 %v4469_v25 }
  0x11   :  { %3911 = vmatpush3.bf16.msra.mxu1 %v4473_v26  ;;  %3912 = vmatprep.subr.bf16.mxu0 %v4364_v3 }
  0x12   :  { %3918 = vmatprep.subr.bf16.mxu1 %v4364_v3 }
  0x13   :  { %3567 = vmatmul.mubr.msk.f32.vlgmr.msra.gmra.mrb[2].mxu0 %vm29_vm2, %v21_v22 }
  0x14   :  { %3578 = vmatmul.mubr.msk.f32.vlgmr.msra.gmra.mrb[2].mxu1 %vm29_vm2, %v21_v22  ;;  %3914 = vmatpush3.bf16.msra.mxu0 %v4399_v4 }
  0x15   :  { %3920 = vmatpush3.bf16.msra.mxu1 %v4410_v8  ;;  %3915 = vmatprep.subr.bf16.mxu0 %v4364_v3 }
  0x16   :  { %3921 = vmatprep.subr.bf16.mxu1 %v4364_v3  ;;  %3588 = vmatprep.mubr.msk.f32.mxu0 %vm4365_vm1, %v4366_v11 }
  0x17   :  { %3599 = vmatprep.mubr.msk.f32.mxu1 %vm4365_vm1, %v4366_v11 }
  0x18   :  { %3917 = vmatpush3.bf16.msra.mxu0 %v4427_v12 }
  0x19   :  { %3923 = vmatpush3.bf16.msra.mxu1 %v4431_v13  ;;  %3924 = vmatprep.subr.bf16.mxu0 %v4364_v3 }
  0x1a   :  { %3930 = vmatprep.subr.bf16.mxu1 %v4364_v3 }
  0xde   :  { %v99_v30 = vpop.f32.mrb[0].mxu0 }
  0xdf   :  { %v104_v31 = vrot.slane %v99_v30, 1  ;;  %v107_v32 = vadd.f32 %v99_v30, %v23_v27  ;;  %v194_v34 = vpop.f32.mrb[0].mxu1  ;;  %v3546_v35 = vpop.f32.mrb[1].mxu0 }
  0xe0   :  { %v199_v36 = vrot.slane %v194_v34, 1  ;;  %v202_v37 = vadd.f32 %v194_v34, %v121_v28  ;;  %v3557_v38 = vpop.f32.mrb[1].mxu1 }
  0xe1   :  { %v108_v39 = vadd.f32 %v104_v31, %v24_v29  ;;  %v3145_v40 = vmul.f32 -1.442695, %v107_v32 }
  0xe2   :  { %v203_v41 = vadd.f32 %v199_v36, %v122_v33  ;;  %v3152_v42 = vmul.f32 -1.442695, %v202_v37 }
  0xe3   :  { %4084 = vpow2.f32 %v3145_v40  ;;  %v3146_v43 = vmul.f32 -1.442695, %v108_v39 }
  0xe4   :  { %4086 = vpow2.f32 %v3152_v42  ;;  %v3153_v44 = vmul.f32 -1.442695, %v203_v41  ;;  %v3166_v41 = vld [vmem:[%s5080_s0 + $0x4] sm:$0x1]  ;;  %v3171_v42 = vld [vmem:[%s5080_s0 + $0x5] sm:$0x1] }
  0xe5   :  { %4088 = vpow2.f32 %v3146_v43  ;;  %v3167_v43 = vld [vmem:[%s5080_s0 + $0x24] sm:$0x1] }
  0xe6   :  { %4090 = vpow2.f32 %v3153_v44  ;;  %v289_v47 = vpop.f32.mrb[2].mxu0 }
  0xe7   :  { %v294_v48 = vrot.slane %v289_v47, 1  ;;  %v374_v50 = vpop.f32.mrb[2].mxu1  ;;  %v3568_v51 = vpop.f32.mrb[3].mxu0  ;;  %v297_v53 = vadd.f32 %v289_v47, %v216_v45  ;;  %v3172_v45 = vld [vmem:[%s5080_s0 + $0x25] sm:$0x1] }
  0xe8   :  { %v379_v54 = vrot.slane %v374_v50, 1  ;;  %v382_v55 = vadd.f32 %v374_v50, %v301_v46  ;;  %v3579_v56 = vpop.f32.mrb[3].mxu1 }
  0xe9   :  { %v298_v59 = vadd.f32 %v294_v48, %v217_v52  ;;  %4092 = vtanh.f32 %v297_v53 }
  0xea   :  { %v383_v57 = vadd.f32 %v379_v54, %v302_v49  ;;  %v3164_v58 = vmul.f32 -1.442695, %v382_v55 }
  0xec   :  { %v3165_v60 = vmul.f32 -1.442695, %v383_v57  ;;  %4094 = vpow2.f32 %v3164_v58 }
  0xed   :  { %v4085_v61 = vpop.eup %4084 }
  0xee   :  { %v4087_v62 = vpop.eup %4086  ;;  %v115_v63 = vadd.f32 1.0, %v4085_v61  ;;  %4096 = vpow2.f32 %v3165_v60  ;;  %v3180_v60 = vld [vmem:[%s5080_s0 + $0x6] sm:$0x1] }
  0xef   :  { %v4089_v0 = vpop.eup %4088  ;;  %v210_v1 = vadd.f32 1.0, %v4087_v62  ;;  %4098 = vtanh.f32 %v298_v59  ;;  %v3187_v59 = vld [vmem:[%s5080_s0 + $0x7] sm:$0x1]  ;;  %v3181_v61 = vld [vmem:[%s5080_s0 + $0x26] sm:$0x1] }
  0xf0   :  { %v4091_v2 = vpop.eup %4090  ;;  %v116_v5 = vadd.f32 1.0, %v4089_v0  ;;  %4100 = vrcp.f32 %v115_v63  ;;  %v3188_v63 = vld [vmem:[%s5080_s0 + $0x27] sm:$0x1] }
  0xf1   :  { %v211_v6 = vadd.f32 1.0, %v4091_v2  ;;  %4102 = vrcp.f32 %v210_v1 }
  0xf2   :  { %4104 = vrcp.f32 %v116_v5 }
  0xf3   :  { %4106 = vrcp.f32 %v211_v6  ;;  %v4093_v7 = vpop.eup %4092 }
  0xf6   :  { %v4095_v9 = vpop.eup %4094 }
  0xf7   :  { %v390_v20 = vadd.f32 1.0, %v4095_v9 }
  0xf8   :  { %v4097_v14 = vpop.eup %4096 }
  0xf9   :  { %v4099_v15 = vpop.eup %4098  ;;  %v391_v23 = vadd.f32 1.0, %v4097_v14  ;;  %4108 = vrcp.f32 %v390_v20 }
  0xfa   :  { %v4101_v16 = vpop.eup %4100 }
  0xfb   :  { %v4103_v21 = vpop.eup %4102  ;;  %v402_v22 = vmul.f32 %v4101_v16, %v4093_v7  ;;  %4110 = vrcp.f32 %v391_v23 }
  0xfc   :  { %v4105_v24 = vpop.eup %4104  ;;  %v400_v27 = vmul.f32 %v4103_v21, %v22_v10 }
  0xfd   :  { %v4107_v28 = vpop.eup %4106  ;;  %v403_v29 = vmul.f32 %v4105_v24, %v4099_v15 }
  0xfe   :  { %v401_v30 = vmul.f32 %v4107_v28, %v397_v17  ;;  %v4522_v31 = vadd.f32 %v402_v22, %v400_v27 }
 0x100   :  { %v4524_v32 = vadd.f32 %v403_v29, %v401_v30  ;;  %4112 = vtanh.f32 %v4522_v31 }
 0x102   :  { %4114 = vtanh.f32 %v4524_v32 }
 0x103   :  { %v4109_v33 = vpop.eup %4108 }
 0x105   :  { %v4111_v34 = vpop.eup %4110 }
 0x10a   :  { %v4113_v35 = vpop.eup %4112 }
 0x10b   :  { %v408_v36 = vmul.f32 %v4113_v35, %v4109_v33 }
 0x10c   :  { %v4115_v37 = vpop.eup %4114 }
 0x10d   :  { %v409_v38 = vmul.f32 %v4115_v37, %v4111_v34  ;;  %411 = vst.msk [vmem:[%s5082_s2] sm:$0x1] %vm410_vm3, %v408_v36 }
 0x10f   :  { %412 = vst.msk [vmem:[%s5082_s2 + $0x8] sm:$0x1] %vm410_vm3, %v409_v38  ;;  %v422_v39 = vrot.slane %v409_v38, 7 }
 0x111   :  { %v424_v40 = vsel %vm423_vm4, %v422_v39, %v408_v36 }
 0x112   :  { %3589 = vmatmul.mubr.msk.f32.vlgmr.msra.gmra.mrb[4].mxu0 %vm29_vm2, %v424_v40  ;;  %3600 = vmatmul.mubr.msk.f32.vlgmr.msra.gmra.mrb[4].mxu1 %vm29_vm2, %v424_v40 }
 0x113   :  { %3926 = vmatpush3.bf16.msra.mxu0 %v4447_v18  ;;  %3932 = vmatpush3.bf16.msra.mxu1 %v4451_v19 }
 0x114   :  { %3927 = vmatprep.subr.bf16.mxu0 %v4364_v3  ;;  %3933 = vmatprep.subr.bf16.mxu1 %v4364_v3 }
 0x115   :  { %3610 = vmatprep.mubr.msk.f32.mxu0 %vm4365_vm1, %v4366_v11  ;;  %3621 = vmatprep.mubr.msk.f32.mxu1 %vm4365_vm1, %v4366_v11 }
 0x117   :  { %3929 = vmatpush3.bf16.msra.mxu0 %v4469_v25  ;;  %3935 = vmatpush3.bf16.msra.mxu1 %v4473_v26 }
 0x118   :  { %3936 = vmatprep.subr.bf16.mxu0 %v4364_v3  ;;  %3942 = vmatprep.subr.bf16.mxu1 %v4364_v3 }
 0x11a   :  { %3611 = vmatmul.mubr.msk.f32.vlgmr.msra.gmra.mrb[6].mxu0 %vm29_vm2, %v424_v40  ;;  %3622 = vmatmul.mubr.msk.f32.vlgmr.msra.gmra.mrb[6].mxu1 %vm29_vm2, %v424_v40 }
 0x11b   :  { %3938 = vmatpush3.bf16.msra.mxu0 %v4399_v4  ;;  %3944 = vmatpush3.bf16.msra.mxu1 %v4410_v8 }
 0x11c   :  { %3939 = vmatprep.subr.bf16.mxu0 %v4364_v3  ;;  %3945 = vmatprep.subr.bf16.mxu1 %v4364_v3 }
 0x11d   :  { %3632 = vmatprep.mubr.msk.f32.mxu0 %vm4365_vm1, %v4366_v11  ;;  %3643 = vmatprep.mubr.msk.f32.mxu1 %vm4365_vm1, %v4366_v11 }
 0x11f   :  { %3941 = vmatpush3.bf16.msra.mxu0 %v4427_v12  ;;  %3947 = vmatpush3.bf16.msra.mxu1 %v4431_v13 }
 0x120   :  { %3948 = vmatprep.subr.bf16.mxu0 %v4364_v3  ;;  %3954 = vmatprep.subr.bf16.mxu1 %v4364_v3 }
 0x1e5   :  { %v493_v44 = vpop.f32.mrb[4].mxu0  ;;  %v587_v46 = vpop.f32.mrb[4].mxu1 }
 0x1e6   :  { %v498_v47 = vrot.slane %v493_v44, 1  ;;  %v501_v48 = vadd.f32 %v3166_v41, %v493_v44  ;;  %v592_v49 = vrot.slane %v587_v46, 1  ;;  %v595_v50 = vadd.f32 %v3171_v42, %v587_v46  ;;  %v3590_v51 = vpop.f32.mrb[5].mxu0  ;;  %v3601_v52 = vpop.f32.mrb[5].mxu1 }
 0x1e8   :  { %v502_v53 = vadd.f32 %v3167_v43, %v498_v47  ;;  %v3169_v54 = vmul.f32 -1.442695, %v501_v48  ;;  %v596_v55 = vadd.f32 %v3172_v45, %v592_v49  ;;  %v3178_v56 = vmul.f32 -1.442695, %v595_v50 }
 0x1ea   :  { %4116 = vpow2.f32 %v3169_v54  ;;  %v3170_v57 = vmul.f32 -1.442695, %v502_v53  ;;  %v3179_v58 = vmul.f32 -1.442695, %v596_v55  ;;  %v3196_v53 = vld [vmem:[%s5080_s0 + $0x8] sm:$0x1] }
 0x1eb   :  { %4118 = vpow2.f32 %v3178_v56  ;;  %v3201_v54 = vld [vmem:[%s5080_s0 + $0x9] sm:$0x1]  ;;  %v3197_v55 = vld [vmem:[%s5080_s0 + $0x28] sm:$0x1] }
 0x1ec   :  { %4120 = vpow2.f32 %v3170_v57  ;;  %v3202_v57 = vld [vmem:[%s5080_s0 + $0x29] sm:$0x1] }
 0x1ed   :  { %4122 = vpow2.f32 %v3179_v58  ;;  %v681_v62 = vpop.f32.mrb[6].mxu0  ;;  %v765_v0 = vpop.f32.mrb[6].mxu1 }
 0x1ee   :  { %v686_v1 = vrot.slane %v681_v62, 1  ;;  %v770_v2 = vrot.slane %v765_v0, 1  ;;  %v773_v5 = vadd.f32 %v3187_v59, %v765_v0  ;;  %v3612_v6 = vpop.f32.mrb[7].mxu0  ;;  %v3623_v7 = vpop.f32.mrb[7].mxu1  ;;  %v689_v9 = vadd.f32 %v3180_v60, %v681_v62 }
 0x1f0   :  { %v690_v10 = vadd.f32 %v3181_v61, %v686_v1  ;;  %v774_v14 = vadd.f32 %v3188_v63, %v770_v2  ;;  %v3194_v15 = vmul.f32 -1.442695, %v773_v5  ;;  %4124 = vtanh.f32 %v689_v9 }
 0x1f2   :  { %v3195_v16 = vmul.f32 -1.442695, %v774_v14  ;;  %4126 = vtanh.f32 %v690_v10  ;;  %v3217_v10 = vld [vmem:[%s5080_s0 + $0xb] sm:$0x1]  ;;  %v3210_v14 = vld [vmem:[%s5080_s0 + $0xa] sm:$0x1] }
 0x1f3   :  { %4128 = vpow2.f32 %v3194_v15  ;;  %v3211_v15 = vld [vmem:[%s5080_s0 + $0x2a] sm:$0x1] }
 0x1f4   :  { %v4117_v17 = vpop.eup %4116  ;;  %4130 = vpow2.f32 %v3195_v16 }
 0x1f5   :  { %v4119_v20 = vpop.eup %4118  ;;  %v509_v21 = vadd.f32 1.0, %v4117_v17  ;;  %v3218_v17 = vld [vmem:[%s5080_s0 + $0x2b] sm:$0x1] }
 0x1f6   :  { %v4121_v22 = vpop.eup %4120  ;;  %v603_v23 = vadd.f32 1.0, %v4119_v20 }
 0x1f7   :  { %v4123_v24 = vpop.eup %4122  ;;  %v510_v27 = vadd.f32 1.0, %v4121_v22  ;;  %4132 = vrcp.f32 %v509_v21 }
 0x1f8   :  { %v604_v28 = vadd.f32 1.0, %v4123_v24  ;;  %4134 = vrcp.f32 %v603_v23 }
 0x1f9   :  { %4136 = vrcp.f32 %v510_v27 }
 0x1fa   :  { %4138 = vrcp.f32 %v604_v28  ;;  %v4125_v29 = vpop.eup %4124 }
 0x1fc   :  { %v4127_v30 = vpop.eup %4126 }
 0x1fd   :  { %v4129_v33 = vpop.eup %4128 }
 0x1fe   :  { %v4131_v34 = vpop.eup %4130  ;;  %v781_v38 = vadd.f32 1.0, %v4129_v33 }
 0x1ff   :  { %v782_v43 = vadd.f32 1.0, %v4131_v34 }
 0x200   :  { %4140 = vrcp.f32 %v781_v38 }
 0x201   :  { %v4133_v35 = vpop.eup %4132 }
 0x202   :  { %v4135_v36 = vpop.eup %4134  ;;  %v789_v37 = vmul.f32 %v4133_v35, %v4125_v29 }
 0x203   :  { %v4137_v39 = vpop.eup %4136  ;;  %v787_v40 = vmul.f32 %v4135_v36, %v4522_v31 }
 0x204   :  { %v4139_v41 = vpop.eup %4138  ;;  %v790_v42 = vmul.f32 %v4137_v39, %v4127_v30 }
 0x205   :  { %v788_v44 = vmul.f32 %v4139_v41, %v4524_v32  ;;  %v4591_v45 = vadd.f32 %v789_v37, %v787_v40 }
 0x207   :  { %v4593_v46 = vadd.f32 %v790_v42, %v788_v44  ;;  %4142 = vtanh.f32 %v4591_v45 }
 0x208   :  { %4144 = vrcp.f32 %v782_v43 }
 0x209   :  { %4146 = vtanh.f32 %v4593_v46 }
 0x20a   :  { %v4141_v47 = vpop.eup %4140 }
 0x211   :  { %v4143_v48 = vpop.eup %4142 }
 0x212   :  { %v4145_v49 = vpop.eup %4144  ;;  %v795_v50 = vmul.f32 %v4143_v48, %v4141_v47 }
 0x213   :  { %v4147_v31 = vpop.eup %4146 }
 0x214   :  { %v796_v51 = vmul.f32 %v4147_v31, %v4145_v49  ;;  %797 = vst.msk [vmem:[%s5082_s2 + $0x1] sm:$0x1] %vm410_vm3, %v795_v50 }
 0x216   :  { %798 = vst.msk [vmem:[%s5082_s2 + $0x9] sm:$0x1] %vm410_vm3, %v796_v51  ;;  %v808_v32 = vrot.slane %v796_v51, 7 }
 0x218   :  { %v809_v52 = vsel %vm423_vm4, %v808_v32, %v795_v50 }
 0x219   :  { %3633 = vmatmul.mubr.msk.f32.vlgmr.msra.gmra.mrb[8].mxu0 %vm29_vm2, %v809_v52  ;;  %3644 = vmatmul.mubr.msk.f32.vlgmr.msra.gmra.mrb[8].mxu1 %vm29_vm2, %v809_v52 }
 0x21a   :  { %3950 = vmatpush3.bf16.msra.mxu0 %v4447_v18  ;;  %3956 = vmatpush3.bf16.msra.mxu1 %v4451_v19 }
 0x21b   :  { %3951 = vmatprep.subr.bf16.mxu0 %v4364_v3  ;;  %3957 = vmatprep.subr.bf16.mxu1 %v4364_v3 }
 0x21c   :  { %3654 = vmatprep.mubr.msk.f32.mxu0 %vm4365_vm1, %v4366_v11  ;;  %3665 = vmatprep.mubr.msk.f32.mxu1 %vm4365_vm1, %v4366_v11 }
 0x21e   :  { %3953 = vmatpush3.bf16.msra.mxu0 %v4469_v25  ;;  %3959 = vmatpush3.bf16.msra.mxu1 %v4473_v26 }
 0x21f   :  { %3960 = vmatprep.subr.bf16.mxu0 %v4364_v3  ;;  %3966 = vmatprep.subr.bf16.mxu1 %v4364_v3 }
 0x221   :  { %3655 = vmatmul.mubr.msk.f32.vlgmr.msra.gmra.mrb[10].mxu0 %vm29_vm2, %v809_v52  ;;  %3666 = vmatmul.mubr.msk.f32.vlgmr.msra.gmra.mrb[10].mxu1 %vm29_vm2, %v809_v52 }
 0x222   :  { %3962 = vmatpush3.bf16.msra.mxu0 %v4399_v4  ;;  %3968 = vmatpush3.bf16.msra.mxu1 %v4410_v8 }
 0x223   :  { %3963 = vmatprep.subr.bf16.mxu0 %v4364_v3  ;;  %3969 = vmatprep.subr.bf16.mxu1 %v4364_v3 }
 0x224   :  { %3676 = vmatprep.mubr.msk.f32.mxu0 %vm4365_vm1, %v4366_v11  ;;  %3687 = vmatprep.mubr.msk.f32.mxu1 %vm4365_vm1, %v4366_v11 }
 0x226   :  { %3965 = vmatpush3.bf16.msra.mxu0 %v4427_v12  ;;  %3971 = vmatpush3.bf16.msra.mxu1 %v4431_v13 }
 0x227   :  { %3972 = vmatprep.subr.bf16.mxu0 %v4364_v3  ;;  %3978 = vmatprep.subr.bf16.mxu1 %v4364_v3 }
 0x2ec   :  { %v878_v56 = vpop.f32.mrb[8].mxu0  ;;  %v972_v58 = vpop.f32.mrb[8].mxu1 }
 0x2ed   :  { %v883_v59 = vrot.slane %v878_v56, 1  ;;  %v886_v60 = vadd.f32 %v3196_v53, %v878_v56  ;;  %v977_v61 = vrot.slane %v972_v58, 1  ;;  %v980_v62 = vadd.f32 %v3201_v54, %v972_v58  ;;  %v3634_v63 = vpop.f32.mrb[9].mxu0  ;;  %v3645_v0 = vpop.f32.mrb[9].mxu1 }
 0x2ef   :  { %v887_v1 = vadd.f32 %v3197_v55, %v883_v59  ;;  %v3199_v2 = vmul.f32 -1.442695, %v886_v60  ;;  %v981_v5 = vadd.f32 %v3202_v57, %v977_v61  ;;  %v3208_v6 = vmul.f32 -1.442695, %v980_v62 }
 0x2f1   :  { %4148 = vpow2.f32 %v3199_v2  ;;  %v3200_v7 = vmul.f32 -1.442695, %v887_v1  ;;  %v3209_v9 = vmul.f32 -1.442695, %v981_v5  ;;  %v3227_v1 = vld [vmem:[%s5080_s0 + $0x2c] sm:$0x1] }
 0x2f2   :  { %4150 = vpow2.f32 %v3208_v6 }
 0x2f3   :  { %4152 = vpow2.f32 %v3200_v7 }
 0x2f4   :  { %4154 = vpow2.f32 %v3209_v9  ;;  %v1066_v16 = vpop.f32.mrb[10].mxu0  ;;  %v1150_v20 = vpop.f32.mrb[10].mxu1 }
 0x2f5   :  { %v1071_v21 = vrot.slane %v1066_v16, 1  ;;  %v1155_v22 = vrot.slane %v1150_v20, 1  ;;  %v1158_v23 = vadd.f32 %v3217_v10, %v1150_v20  ;;  %v3656_v24 = vpop.f32.mrb[11].mxu0  ;;  %v3667_v27 = vpop.f32.mrb[11].mxu1  ;;  %v1074_v28 = vadd.f32 %v3210_v14, %v1066_v16 }
 0x2f6   :  { %v3240_v24 = vld [vmem:[%s5080_s0 + $0xe] sm:$0x1] }
 0x2f7   :  { %v1075_v29 = vadd.f32 %v3211_v15, %v1071_v21  ;;  %v1159_v30 = vadd.f32 %v3218_v17, %v1155_v22  ;;  %v3224_v33 = vmul.f32 -1.442695, %v1158_v23  ;;  %4156 = vtanh.f32 %v1074_v28  ;;  %v3247_v23 = vld [vmem:[%s5080_s0 + $0xf] sm:$0x1]  ;;  %v3241_v27 = vld [vmem:[%s5080_s0 + $0x2e] sm:$0x1] }
 0x2f9   :  { %v3225_v34 = vmul.f32 -1.442695, %v1159_v30  ;;  %4158 = vtanh.f32 %v1075_v29  ;;  %v3248_v29 = vld [vmem:[%s5080_s0 + $0x2f] sm:$0x1] }
 0x2fa   :  { %4160 = vpow2.f32 %v3224_v33 }
 0x2fb   :  { %v4149_v35 = vpop.eup %4148  ;;  %4162 = vpow2.f32 %v3225_v34 }
 0x2fc   :  { %v4151_v36 = vpop.eup %4150  ;;  %v894_v37 = vadd.f32 1.0, %v4149_v35 }
 0x2fd   :  { %v4153_v38 = vpop.eup %4152  ;;  %v988_v39 = vadd.f32 1.0, %v4151_v36 }
 0x2fe   :  { %v4155_v40 = vpop.eup %4154  ;;  %v895_v41 = vadd.f32 1.0, %v4153_v38  ;;  %4164 = vrcp.f32 %v894_v37 }
 0x2ff   :  { %v989_v42 = vadd.f32 1.0, %v4155_v40  ;;  %4166 = vrcp.f32 %v988_v39 }
 0x300   :  { %4168 = vrcp.f32 %v895_v41 }
 0x301   :  { %4170 = vrcp.f32 %v989_v42  ;;  %v4157_v43 = vpop.eup %4156 }
 0x303   :  { %v4159_v44 = vpop.eup %4158 }
 0x304   :  { %v4161_v47 = vpop.eup %4160 }
 0x305   :  { %v4163_v48 = vpop.eup %4162  ;;  %v1166_v51 = vadd.f32 1.0, %v4161_v47 }
 0x306   :  { %v1167_v55 = vadd.f32 1.0, %v4163_v48 }
 0x307   :  { %4172 = vrcp.f32 %v1166_v51 }
 0x308   :  { %v4165_v49 = vpop.eup %4164 }
 0x309   :  { %v4167_v50 = vpop.eup %4166  ;;  %v1174_v31 = vmul.f32 %v4165_v49, %v4157_v43 }
 0x30a   :  { %v4169_v32 = vpop.eup %4168  ;;  %v1172_v52 = vmul.f32 %v4167_v50, %v4591_v45 }
 0x30b   :  { %v4171_v53 = vpop.eup %4170  ;;  %v1175_v54 = vmul.f32 %v4169_v32, %v4159_v44 }
 0x30c   :  { %v1173_v56 = vmul.f32 %v4171_v53, %v4593_v46  ;;  %v4660_v57 = vadd.f32 %v1174_v31, %v1172_v52 }
 0x30e   :  { %v4662_v58 = vadd.f32 %v1175_v54, %v1173_v56  ;;  %4174 = vtanh.f32 %v4660_v57 }
 0x30f   :  { %4176 = vrcp.f32 %v1167_v55 }
 0x310   :  { %4178 = vtanh.f32 %v4662_v58 }
 0x311   :  { %v4173_v59 = vpop.eup %4172 }
 0x318   :  { %v4175_v60 = vpop.eup %4174 }
 0x319   :  { %v4177_v61 = vpop.eup %4176  ;;  %v1180_v62 = vmul.f32 %v4175_v60, %v4173_v59 }
 0x31a   :  { %v4179_v45 = vpop.eup %4178 }
 0x31b   :  { %v1181_v63 = vmul.f32 %v4179_v45, %v4177_v61  ;;  %1182 = vst.msk [vmem:[%s5082_s2 + $0x2] sm:$0x1] %vm410_vm3, %v1180_v62 }
 0x31d   :  { %1183 = vst.msk [vmem:[%s5082_s2 + $0xa] sm:$0x1] %vm410_vm3, %v1181_v63  ;;  %v1193_v46 = vrot.slane %v1181_v63, 7 }
 0x31f   :  { %v1194_v0 = vsel %vm423_vm4, %v1193_v46, %v1180_v62 }
 0x320   :  { %3677 = vmatmul.mubr.msk.f32.vlgmr.msra.gmra.mrb[12].mxu0 %vm29_vm2, %v1194_v0  ;;  %3688 = vmatmul.mubr.msk.f32.vlgmr.msra.gmra.mrb[12].mxu1 %vm29_vm2, %v1194_v0 }
 0x321   :  { %3974 = vmatpush3.bf16.msra.mxu0 %v4447_v18  ;;  %3980 = vmatpush3.bf16.msra.mxu1 %v4451_v19 }
 0x322   :  { %3975 = vmatprep.subr.bf16.mxu0 %v4364_v3  ;;  %3981 = vmatprep.subr.bf16.mxu1 %v4364_v3 }
 0x323   :  { %3698 = vmatprep.mubr.msk.f32.mxu0 %vm4365_vm1, %v4366_v11  ;;  %3709 = vmatprep.mubr.msk.f32.mxu1 %vm4365_vm1, %v4366_v11 }
 0x325   :  { %3977 = vmatpush3.bf16.msra.mxu0 %v4469_v25  ;;  %3983 = vmatpush3.bf16.msra.mxu1 %v4473_v26 }
 0x326   :  { %3984 = vmatprep.subr.bf16.mxu0 %v4364_v3  ;;  %3990 = vmatprep.subr.bf16.mxu1 %v4364_v3 }
 0x328   :  { %3699 = vmatmul.mubr.msk.f32.vlgmr.msra.gmra.mrb[14].mxu0 %vm29_vm2, %v1194_v0  ;;  %3710 = vmatmul.mubr.msk.f32.vlgmr.msra.gmra.mrb[14].mxu1 %vm29_vm2, %v1194_v0 }
 0x329   :  { %3986 = vmatpush3.bf16.msra.mxu0 %v4399_v4  ;;  %3992 = vmatpush3.bf16.msra.mxu1 %v4410_v8  ;;  %v3226_v4 = vld [vmem:[%s5080_s0 + $0xc] sm:$0x1]  ;;  %v3231_v8 = vld [vmem:[%s5080_s0 + $0xd] sm:$0x1] }
 0x32a   :  { %3987 = vmatprep.subr.bf16.mxu0 %v4364_v3  ;;  %3993 = vmatprep.subr.bf16.mxu1 %v4364_v3 }
 0x32b   :  { %3720 = vmatprep.mubr.msk.f32.mxu0 %vm4365_vm1, %v4366_v11  ;;  %3731 = vmatprep.mubr.msk.f32.mxu1 %vm4365_vm1, %v4366_v11 }
 0x32d   :  { %3989 = vmatpush3.bf16.msra.mxu0 %v4427_v12  ;;  %3995 = vmatpush3.bf16.msra.mxu1 %v4431_v13  ;;  %v3232_v12 = vld [vmem:[%s5080_s0 + $0x2d] sm:$0x1] }
 0x32e   :  { %3996 = vmatprep.subr.bf16.mxu0 %v4364_v3  ;;  %4002 = vmatprep.subr.bf16.mxu1 %v4364_v3 }
 0x3f3   :  { %v1263_v2 = vpop.f32.mrb[12].mxu0  ;;  %v1357_v13 = vpop.f32.mrb[12].mxu1 }
 0x3f4   :  { %v1268_v5 = vrot.slane %v1263_v2, 1  ;;  %v1271_v6 = vadd.f32 %v3226_v4, %v1263_v2  ;;  %v1362_v7 = vrot.slane %v1357_v13, 1  ;;  %v1365_v9 = vadd.f32 %v3231_v8, %v1357_v13  ;;  %v3678_v10 = vpop.f32.mrb[13].mxu0  ;;  %v3689_v14 = vpop.f32.mrb[13].mxu1 }
 0x3f5   :  { %v1960_v10 = vld [vmem:[%s5081_s1 + $0x18] sm:$0xff] }
 0x3f6   :  { %v1272_v15 = vadd.f32 %v3227_v1, %v1268_v5  ;;  %v3229_v16 = vmul.f32 -1.442695, %v1271_v6  ;;  %v1366_v17 = vadd.f32 %v3232_v12, %v1362_v7  ;;  %v3238_v20 = vmul.f32 -1.442695, %v1365_v9  ;;  %v3294_v7 = vld [vmem:[%s5081_s1 + $0x28] sm:$0xff]  ;;  %v1959_v9 = vld [vmem:[%s5081_s1 + $0x10] sm:$0xff] }
 0x3f8   :  { %4180 = vpow2.f32 %v3229_v16  ;;  %v3230_v21 = vmul.f32 -1.442695, %v1272_v15  ;;  %v3239_v22 = vmul.f32 -1.442695, %v1366_v17  ;;  %v3295_v15 = vld [vmem:[%s5081_s1 + $0x30] sm:$0xff]  ;;  %v3296_v16 = vld [vmem:[%s5081_s1 + $0x38] sm:$0xff]  ;;  %v4793_v17 = vpack.c.bf16 %v1960_v10, %v1959_v9 }
 0x3f9   :  { %4182 = vpow2.f32 %v3238_v20  ;;  %v4797_v20 = vpack.c.bf16 %v3296_v16, %v3295_v15 }
 0x3fa   :  { %4184 = vpow2.f32 %v3230_v21  ;;  %v3256_v21 = vld [vmem:[%s5080_s0 + $0x10] sm:$0x1] }
 0x3fb   :  { %4186 = vpow2.f32 %v3239_v22  ;;  %v1451_v28 = vpop.f32.mrb[14].mxu0  ;;  %v1535_v30 = vpop.f32.mrb[14].mxu1  ;;  %v3261_v22 = vld [vmem:[%s5080_s0 + $0x11] sm:$0x1] }
 0x3fc   :  { %v1456_v33 = vrot.slane %v1451_v28, 1  ;;  %v1540_v34 = vrot.slane %v1535_v30, 1  ;;  %v1543_v35 = vadd.f32 %v3247_v23, %v1535_v30  ;;  %v3700_v36 = vpop.f32.mrb[15].mxu0  ;;  %v3711_v37 = vpop.f32.mrb[15].mxu1  ;;  %v1459_v38 = vadd.f32 %v3240_v24, %v1451_v28  ;;  %v3257_v23 = vld [vmem:[%s5080_s0 + $0x30] sm:$0x1] }
 0x3fe   :  { %v1460_v39 = vadd.f32 %v3241_v27, %v1456_v33  ;;  %v1544_v40 = vadd.f32 %v3248_v29, %v1540_v34  ;;  %v3254_v41 = vmul.f32 -1.442695, %v1543_v35  ;;  %4188 = vtanh.f32 %v1459_v38  ;;  %v3262_v27 = vld [vmem:[%s5080_s0 + $0x31] sm:$0x1] }
 0x400   :  { %v3255_v42 = vmul.f32 -1.442695, %v1544_v40  ;;  %4190 = vtanh.f32 %v1460_v39 }
 0x401   :  { %4192 = vpow2.f32 %v3254_v41 }
 0x402   :  { %v4181_v43 = vpop.eup %4180  ;;  %4194 = vpow2.f32 %v3255_v42 }
 0x403   :  { %v4183_v44 = vpop.eup %4182  ;;  %v1279_v47 = vadd.f32 1.0, %v4181_v43  ;;  %v3277_v43 = vld [vmem:[%s5080_s0 + $0x13] sm:$0x1] }
 0x404   :  { %v4185_v48 = vpop.eup %4184  ;;  %v1373_v49 = vadd.f32 1.0, %v4183_v44  ;;  %v3270_v44 = vld [vmem:[%s5080_s0 + $0x12] sm:$0x1] }
 0x405   :  { %v4187_v50 = vpop.eup %4186  ;;  %v1280_v31 = vadd.f32 1.0, %v4185_v48  ;;  %4196 = vrcp.f32 %v1279_v47  ;;  %v3271_v47 = vld [vmem:[%s5080_s0 + $0x32] sm:$0x1] }
 0x406   :  { %v1374_v51 = vadd.f32 1.0, %v4187_v50  ;;  %4198 = vrcp.f32 %v1373_v49  ;;  %v3278_v49 = vld [vmem:[%s5080_s0 + $0x33] sm:$0x1] }
 0x407   :  { %4200 = vrcp.f32 %v1280_v31 }
 0x408   :  { %4202 = vrcp.f32 %v1374_v51  ;;  %v4189_v32 = vpop.eup %4188 }
 0x40a   :  { %v4191_v52 = vpop.eup %4190 }
 0x40b   :  { %v4193_v53 = vpop.eup %4192 }
 0x40c   :  { %v4195_v54 = vpop.eup %4194  ;;  %v1551_v60 = vadd.f32 1.0, %v4193_v53 }
 0x40d   :  { %v1552_v46 = vadd.f32 1.0, %v4195_v54 }
 0x40e   :  { %4204 = vrcp.f32 %v1551_v60 }
 0x40f   :  { %v4197_v55 = vpop.eup %4196 }
 0x410   :  { %v4199_v56 = vpop.eup %4198  ;;  %v1559_v59 = vmul.f32 %v4197_v55, %v4189_v32 }
 0x411   :  { %v4201_v61 = vpop.eup %4200  ;;  %v1557_v62 = vmul.f32 %v4199_v56, %v4660_v57 }
 0x412   :  { %v4203_v45 = vpop.eup %4202  ;;  %v1560_v63 = vmul.f32 %v4201_v61, %v4191_v52 }
 0x413   :  { %v1558_v0 = vmul.f32 %v4203_v45, %v4662_v58  ;;  %v4729_v4 = vadd.f32 %v1559_v59, %v1557_v62 }
 0x415   :  { %v4731_v8 = vadd.f32 %v1560_v63, %v1558_v0  ;;  %4206 = vtanh.f32 %v4729_v4 }
 0x416   :  { %4208 = vrcp.f32 %v1552_v46 }
 0x417   :  { %4210 = vtanh.f32 %v4731_v8 }
 0x418   :  { %v4205_v1 = vpop.eup %4204 }
 0x41f   :  { %v4207_v2 = vpop.eup %4206 }
 0x420   :  { %v4209_v12 = vpop.eup %4208  ;;  %v1565_v13 = vmul.f32 %v4207_v2, %v4205_v1 }
 0x421   :  { %v4211_v57 = vpop.eup %4210 }
 0x422   :  { %v1566_v5 = vmul.f32 %v4211_v57, %v4209_v12  ;;  %1567 = vst.msk [vmem:[%s5082_s2 + $0x3] sm:$0x1] %vm410_vm3, %v1565_v13 }
 0x424   :  { %1568 = vst.msk [vmem:[%s5082_s2 + $0xb] sm:$0x1] %vm410_vm3, %v1566_v5  ;;  %v1578_v58 = vrot.slane %v1566_v5, 7 }
 0x426   :  { %v1579_v6 = vsel %vm423_vm4, %v1578_v58, %v1565_v13 }
 0x427   :  { %3721 = vmatmul.mubr.msk.f32.vlgmr.msra.gmra.mrb[16].mxu0 %vm29_vm2, %v1579_v6  ;;  %3732 = vmatmul.mubr.msk.f32.vlgmr.msra.gmra.mrb[16].mxu1 %vm29_vm2, %v1579_v6 }
 0x428   :  { %3998 = vmatpush3.bf16.msra.mxu0 %v4447_v18  ;;  %4004 = vmatpush3.bf16.msra.mxu1 %v4451_v19  ;;  %v1957_v18 = vld [vmem:[%s5081_s1] sm:$0xff]  ;;  %v1958_v19 = vld [vmem:[%s5081_s1 + $0x8] sm:$0xff] }
 0x429   :  { %3999 = vmatprep.subr.bf16.mxu0 %v4364_v3  ;;  %4005 = vmatprep.subr.bf16.mxu1 %v4364_v3 }
 0x42a   :  { %3742 = vmatprep.mubr.msk.f32.mxu0 %vm4365_vm1, %v4366_v11  ;;  %3753 = vmatprep.mubr.msk.f32.mxu1 %vm4365_vm1, %v4366_v11 }
 0x42c   :  { %4001 = vmatpush3.bf16.msra.mxu0 %v4469_v25  ;;  %4007 = vmatpush3.bf16.msra.mxu1 %v4473_v26  ;;  %v3293_v25 = vld [vmem:[%s5081_s1 + $0x20] sm:$0xff]  ;;  %v4773_v26 = vpack.c.bf16 %v1958_v19, %v1957_v18 }
 0x42d   :  { %4008 = vmatprep.subr.bf16.mxu0 %v4364_v3  ;;  %4014 = vmatprep.subr.bf16.mxu1 %v4364_v3  ;;  %v4784_v14 = vpack.c.bf16 %v3294_v7, %v3293_v25 }
 0x42f   :  { %3743 = vmatmul.mubr.msk.f32.vlgmr.msra.gmra.mrb[18].mxu0 %vm29_vm2, %v1579_v6  ;;  %3754 = vmatmul.mubr.msk.f32.vlgmr.msra.gmra.mrb[18].mxu1 %vm29_vm2, %v1579_v6 }
 0x430   :  { %3764 = vmatprep.mubr.msk.f32.mxu0 %vm4365_vm1, %v4366_v11  ;;  %3775 = vmatprep.mubr.msk.f32.mxu1 %vm4365_vm1, %v4366_v11 }
 0x431   :  { %4010 = vmatpush3.bf16.msra.mxu0 %v4773_v26  ;;  %4016 = vmatpush3.bf16.msra.mxu1 %v4784_v14 }
 0x432   :  { %4011 = vmatprep.subr.bf16.mxu0 %v4364_v3  ;;  %4017 = vmatprep.subr.bf16.mxu1 %v4364_v3 }
 0x435   :  { %4013 = vmatpush3.bf16.msra.mxu0 %v4793_v17  ;;  %4019 = vmatpush3.bf16.msra.mxu1 %v4797_v20 }
 0x436   :  { %4020 = vmatprep.subr.bf16.mxu0 %v4364_v3  ;;  %4026 = vmatprep.subr.bf16.mxu1 %v4364_v3 }
 0x4fa   :  { %v1648_v24 = vpop.f32.mrb[16].mxu0  ;;  %v1742_v28 = vpop.f32.mrb[16].mxu1 }
 0x4fb   :  { %v1653_v29 = vrot.slane %v1648_v24, 1  ;;  %v1656_v30 = vadd.f32 %v3256_v21, %v1648_v24  ;;  %v1747_v33 = vrot.slane %v1742_v28, 1  ;;  %v1750_v34 = vadd.f32 %v3261_v22, %v1742_v28  ;;  %v3722_v35 = vpop.f32.mrb[17].mxu0  ;;  %v3733_v36 = vpop.f32.mrb[17].mxu1 }
 0x4fd   :  { %v1657_v37 = vadd.f32 %v3257_v23, %v1653_v29  ;;  %v3259_v38 = vmul.f32 -1.442695, %v1656_v30  ;;  %v1751_v39 = vadd.f32 %v3262_v27, %v1747_v33  ;;  %v3268_v40 = vmul.f32 -1.442695, %v1750_v34  ;;  %v3309_v30 = vld [vmem:[%s5081_s1 + $0x60] sm:$0xff]  ;;  %v3310_v33 = vld [vmem:[%s5081_s1 + $0x68] sm:$0xff] }
 0x4ff   :  { %4212 = vpow2.f32 %v3259_v38  ;;  %v3260_v41 = vmul.f32 -1.442695, %v1657_v37  ;;  %v3269_v42 = vmul.f32 -1.442695, %v1751_v39  ;;  %v4858_v37 = vpack.c.bf16 %v3310_v33, %v3309_v30  ;;  %v3304_v38 = vld [vmem:[%s5081_s1 + $0x50] sm:$0xff]  ;;  %v3305_v39 = vld [vmem:[%s5081_s1 + $0x58] sm:$0xff] }
 0x500   :  { %4214 = vpow2.f32 %v3268_v40  ;;  %v3311_v40 = vld [vmem:[%s5081_s1 + $0x70] sm:$0xff] }
 0x501   :  { %4216 = vpow2.f32 %v3260_v41  ;;  %v3312_v41 = vld [vmem:[%s5081_s1 + $0x78] sm:$0xff] }
 0x502   :  { %4218 = vpow2.f32 %v3269_v42  ;;  %v1836_v48 = vpop.f32.mrb[18].mxu0  ;;  %v1920_v50 = vpop.f32.mrb[18].mxu1 }
 0x503   :  { %v1841_v31 = vrot.slane %v1836_v48, 1  ;;  %v1925_v51 = vrot.slane %v1920_v50, 1  ;;  %v1928_v32 = vadd.f32 %v3277_v43, %v1920_v50  ;;  %v3744_v52 = vpop.f32.mrb[19].mxu0  ;;  %v3755_v53 = vpop.f32.mrb[19].mxu1  ;;  %v1844_v54 = vadd.f32 %v3270_v44, %v1836_v48  ;;  %v3291_v48 = vld [vmem:[%s5080_s0 + $0x15] sm:$0x1] }
 0x504   :  { %v4877_v43 = vpack.c.bf16 %v3305_v39, %v3304_v38  ;;  %v4879_v44 = vpack.c.bf16 %v3312_v41, %v3311_v40 }
 0x505   :  { %v1845_v55 = vadd.f32 %v3271_v47, %v1841_v31  ;;  %v1929_v56 = vadd.f32 %v3278_v49, %v1925_v51  ;;  %v3284_v59 = vmul.f32 -1.442695, %v1928_v32  ;;  %4220 = vtanh.f32 %v1844_v54  ;;  %v3286_v47 = vld [vmem:[%s5080_s0 + $0x14] sm:$0x1]  ;;  %v3292_v31 = vld [vmem:[%s5080_s0 + $0x35] sm:$0x1] }
 0x506   :  { %v3287_v49 = vld [vmem:[%s5080_s0 + $0x34] sm:$0x1] }
 0x507   :  { %v3285_v60 = vmul.f32 -1.442695, %v1929_v56  ;;  %4222 = vtanh.f32 %v1845_v55 }
 0x508   :  { %4224 = vpow2.f32 %v3284_v59 }
 0x509   :  { %v4213_v61 = vpop.eup %4212  ;;  %4226 = vpow2.f32 %v3285_v60 }
 0x50a   :  { %v4215_v62 = vpop.eup %4214  ;;  %v1664_v45 = vadd.f32 1.0, %v4213_v61 }
 0x50b   :  { %v4217_v63 = vpop.eup %4216  ;;  %v1758_v46 = vadd.f32 1.0, %v4215_v62 }
 0x50c   :  { %v4219_v0 = vpop.eup %4218  ;;  %v1665_v1 = vadd.f32 1.0, %v4217_v63  ;;  %4228 = vrcp.f32 %v1664_v45 }
 0x50d   :  { %v1759_v2 = vadd.f32 1.0, %v4219_v0  ;;  %4230 = vrcp.f32 %v1758_v46  ;;  %v3307_v46 = vld [vmem:[%s5080_s0 + $0x17] sm:$0x1]  ;;  %v3300_v0 = vld [vmem:[%s5080_s0 + $0x16] sm:$0x1] }
 0x50e   :  { %4232 = vrcp.f32 %v1665_v1  ;;  %v3301_v1 = vld [vmem:[%s5080_s0 + $0x36] sm:$0x1] }
 0x50f   :  { %4234 = vrcp.f32 %v1759_v2  ;;  %v4221_v12 = vpop.eup %4220 }
 0x511   :  { %v4223_v13 = vpop.eup %4222 }
 0x512   :  { %v4225_v57 = vpop.eup %4224 }
 0x513   :  { %v4227_v5 = vpop.eup %4226  ;;  %v1936_v19 = vadd.f32 1.0, %v4225_v57 }
 0x514   :  { %v1937_v15 = vadd.f32 1.0, %v4227_v5 }
 0x515   :  { %4236 = vrcp.f32 %v1936_v19 }
 0x516   :  { %v4229_v58 = vpop.eup %4228 }
 0x517   :  { %v4231_v6 = vpop.eup %4230  ;;  %v1944_v18 = vmul.f32 %v4229_v58, %v4221_v12  ;;  %v3308_v12 = vld [vmem:[%s5080_s0 + $0x37] sm:$0x1] }
 0x518   :  { %v4233_v25 = vpop.eup %4232  ;;  %v1942_v7 = vmul.f32 %v4231_v6, %v4729_v4  ;;  %v3302_v4 = vld [vmem:[%s5081_s1 + $0x40] sm:$0xff] }
 0x519   :  { %v4235_v9 = vpop.eup %4234  ;;  %v1945_v10 = vmul.f32 %v4233_v25, %v4223_v13 }
 0x51a   :  { %v1943_v16 = vmul.f32 %v4235_v9, %v4731_v8  ;;  %v4830_v21 = vadd.f32 %v1944_v18, %v1942_v7  ;;  %v3303_v8 = vld [vmem:[%s5081_s1 + $0x48] sm:$0xff] }
 0x51b   :  { %v4856_v36 = vpack.c.bf16 %v3303_v8, %v3302_v4 }
 0x51c   :  { %v4832_v22 = vadd.f32 %v1945_v10, %v1943_v16  ;;  %4238 = vtanh.f32 %v4830_v21 }
 0x51d   :  { %4240 = vrcp.f32 %v1937_v15 }
 0x51e   :  { %4242 = vtanh.f32 %v4832_v22 }
 0x51f   :  { %v4237_v23 = vpop.eup %4236 }
 0x526   :  { %v4239_v24 = vpop.eup %4238 }
 0x527   :  { %v4241_v27 = vpop.eup %4240  ;;  %v1950_v28 = vmul.f32 %v4239_v24, %v4237_v23 }
 0x528   :  { %v4243_v29 = vpop.eup %4242 }
 0x529   :  { %v1951_v34 = vmul.f32 %v4243_v29, %v4241_v27  ;;  %1952 = vst.msk [vmem:[%s5082_s2 + $0x4] sm:$0x1] %vm410_vm3, %v1950_v28 }
 0x52b   :  { %1953 = vst.msk [vmem:[%s5082_s2 + $0xc] sm:$0x1] %vm410_vm3, %v1951_v34  ;;  %v1963_v35 = vrot.slane %v1951_v34, 7 }
 0x52d   :  { %v1964_v42 = vsel %vm423_vm4, %v1963_v35, %v1950_v28 }
 0x52e   :  { %3765 = vmatmul.mubr.msk.f32.vlgmr.msra.gmra.mrb[20].mxu0 %vm29_vm2, %v1964_v42  ;;  %3776 = vmatmul.mubr.msk.f32.vlgmr.msra.gmra.mrb[20].mxu1 %vm29_vm2, %v1964_v42 }
 0x52f   :  { %4022 = vmatpush3.bf16.msra.mxu0 %v4856_v36  ;;  %4028 = vmatpush3.bf16.msra.mxu1 %v4858_v37 }
 0x530   :  { %4023 = vmatprep.subr.bf16.mxu0 %v4364_v3  ;;  %4029 = vmatprep.subr.bf16.mxu1 %v4364_v3 }
 0x531   :  { %3786 = vmatprep.mubr.msk.f32.mxu0 %vm4365_vm1, %v4366_v11  ;;  %3797 = vmatprep.mubr.msk.f32.mxu1 %vm4365_vm1, %v4366_v11 }
 0x533   :  { %4025 = vmatpush3.bf16.msra.mxu0 %v4877_v43  ;;  %4031 = vmatpush3.bf16.msra.mxu1 %v4879_v44 }
 0x534   :  { %4032 = vmatprep.subr.bf16.mxu0 %v4364_v3  ;;  %4038 = vmatprep.subr.bf16.mxu1 %v4364_v3 }
 0x536   :  { %3787 = vmatmul.mubr.msk.f32.vlgmr.msra.gmra.mrb[22].mxu0 %vm29_vm2, %v1964_v42  ;;  %3798 = vmatmul.mubr.msk.f32.vlgmr.msra.gmra.mrb[22].mxu1 %vm29_vm2, %v1964_v42 }
 0x537   :  { %4034 = vmatpush3.bf16.msra.mxu0 %v4773_v26  ;;  %4040 = vmatpush3.bf16.msra.mxu1 %v4784_v14 }
 0x538   :  { %4035 = vmatprep.subr.bf16.mxu0 %v4364_v3  ;;  %4041 = vmatprep.subr.bf16.mxu1 %v4364_v3 }
 0x539   :  { %3808 = vmatprep.mubr.msk.f32.mxu0 %vm4365_vm1, %v4366_v11  ;;  %3819 = vmatprep.mubr.msk.f32.mxu1 %vm4365_vm1, %v4366_v11 }
 0x53b   :  { %4037 = vmatpush3.bf16.msra.mxu0 %v4793_v17  ;;  %4043 = vmatpush3.bf16.msra.mxu1 %v4797_v20 }
 0x53c   :  { %4044 = vmatprep.subr.bf16.mxu0 %v4364_v3  ;;  %4050 = vmatprep.subr.bf16.mxu1 %v4364_v3 }
 0x601   :  { %v2033_v50 = vpop.f32.mrb[20].mxu0  ;;  %v2127_v51 = vpop.f32.mrb[20].mxu1 }
 0x602   :  { %v2038_v32 = vrot.slane %v2033_v50, 1  ;;  %v2041_v52 = vadd.f32 %v3286_v47, %v2033_v50  ;;  %v2132_v53 = vrot.slane %v2127_v51, 1  ;;  %v2135_v54 = vadd.f32 %v3291_v48, %v2127_v51  ;;  %v3766_v55 = vpop.f32.mrb[21].mxu0  ;;  %v3777_v56 = vpop.f32.mrb[21].mxu1 }
 0x604   :  { %v2042_v59 = vadd.f32 %v3287_v49, %v2038_v32  ;;  %v3289_v60 = vmul.f32 -1.442695, %v2041_v52  ;;  %v2136_v61 = vadd.f32 %v3292_v31, %v2132_v53  ;;  %v3298_v62 = vmul.f32 -1.442695, %v2135_v54 }
 0x606   :  { %4244 = vpow2.f32 %v3289_v60  ;;  %v3290_v45 = vmul.f32 -1.442695, %v2042_v59  ;;  %v3299_v63 = vmul.f32 -1.442695, %v2136_v61  ;;  %v3317_v59 = vld [vmem:[%s5080_s0 + $0x38] sm:$0x1] }
 0x607   :  { %4246 = vpow2.f32 %v3298_v62 }
 0x608   :  { %4248 = vpow2.f32 %v3290_v45 }
 0x609   :  { %4250 = vpow2.f32 %v3299_v63  ;;  %v2221_v2 = vpop.f32.mrb[22].mxu0  ;;  %v2305_v13 = vpop.f32.mrb[22].mxu1 }
 0x60a   :  { %v2226_v57 = vrot.slane %v2221_v2, 1  ;;  %v2310_v5 = vrot.slane %v2305_v13, 1  ;;  %v2313_v58 = vadd.f32 %v3307_v46, %v2305_v13  ;;  %v3788_v6 = vpop.f32.mrb[23].mxu0  ;;  %v3799_v18 = vpop.f32.mrb[23].mxu1  ;;  %v2229_v19 = vadd.f32 %v3300_v0, %v2221_v2 }
 0x60b   :  { %v3330_v6 = vld [vmem:[%s5080_s0 + $0x1a] sm:$0x1] }
 0x60c   :  { %v2230_v25 = vadd.f32 %v3301_v1, %v2226_v57  ;;  %v2314_v7 = vadd.f32 %v3308_v12, %v2310_v5  ;;  %v3314_v9 = vmul.f32 -1.442695, %v2313_v58  ;;  %4252 = vtanh.f32 %v2229_v19  ;;  %v3337_v58 = vld [vmem:[%s5080_s0 + $0x1b] sm:$0x1]  ;;  %v3331_v18 = vld [vmem:[%s5080_s0 + $0x3a] sm:$0x1] }
 0x60e   :  { %v3315_v10 = vmul.f32 -1.442695, %v2314_v7  ;;  %4254 = vtanh.f32 %v2230_v25  ;;  %v3338_v25 = vld [vmem:[%s5080_s0 + $0x3b] sm:$0x1] }
 0x60f   :  { %4256 = vpow2.f32 %v3314_v9 }
 0x610   :  { %v4245_v15 = vpop.eup %4244  ;;  %4258 = vpow2.f32 %v3315_v10 }
 0x611   :  { %v4247_v16 = vpop.eup %4246  ;;  %v2049_v23 = vadd.f32 1.0, %v4245_v15 }
 0x612   :  { %v4249_v24 = vpop.eup %4248  ;;  %v2143_v27 = vadd.f32 1.0, %v4247_v16 }
 0x613   :  { %v4251_v28 = vpop.eup %4250  ;;  %v2050_v4 = vadd.f32 1.0, %v4249_v24  ;;  %4260 = vrcp.f32 %v2049_v23 }
 0x614   :  { %v2144_v29 = vadd.f32 1.0, %v4251_v28  ;;  %4262 = vrcp.f32 %v2143_v27 }
 0x615   :  { %4264 = vrcp.f32 %v2050_v4 }
 0x616   :  { %4266 = vrcp.f32 %v2144_v29  ;;  %v4253_v8 = vpop.eup %4252 }
 0x618   :  { %v4255_v30 = vpop.eup %4254 }
 0x619   :  { %v4257_v33 = vpop.eup %4256 }
 0x61a   :  { %v4259_v34 = vpop.eup %4258  ;;  %v2321_v40 = vadd.f32 1.0, %v4257_v33 }
 0x61b   :  { %v2322_v49 = vadd.f32 1.0, %v4259_v34 }
 0x61c   :  { %4268 = vrcp.f32 %v2321_v40 }
 0x61d   :  { %v4261_v35 = vpop.eup %4260 }
 0x61e   :  { %v4263_v38 = vpop.eup %4262  ;;  %v2329_v39 = vmul.f32 %v4261_v35, %v4253_v8 }
 0x61f   :  { %v4265_v41 = vpop.eup %4264  ;;  %v2327_v42 = vmul.f32 %v4263_v38, %v4830_v21 }
 0x620   :  { %v4267_v47 = vpop.eup %4266  ;;  %v2330_v48 = vmul.f32 %v4265_v41, %v4255_v30 }
 0x621   :  { %v2328_v50 = vmul.f32 %v4267_v47, %v4832_v22  ;;  %v4931_v31 = vadd.f32 %v2329_v39, %v2327_v42 }
 0x623   :  { %v4933_v51 = vadd.f32 %v2330_v48, %v2328_v50  ;;  %4270 = vtanh.f32 %v4931_v31 }
 0x624   :  { %4272 = vrcp.f32 %v2322_v49 }
 0x625   :  { %4274 = vtanh.f32 %v4933_v51 }
 0x626   :  { %v4269_v32 = vpop.eup %4268 }
 0x62d   :  { %v4271_v52 = vpop.eup %4270 }
 0x62e   :  { %v4273_v53 = vpop.eup %4272  ;;  %v2335_v54 = vmul.f32 %v4271_v52, %v4269_v32 }
 0x62f   :  { %v4275_v21 = vpop.eup %4274 }
 0x630   :  { %v2336_v55 = vmul.f32 %v4275_v21, %v4273_v53  ;;  %2337 = vst.msk [vmem:[%s5082_s2 + $0x5] sm:$0x1] %vm410_vm3, %v2335_v54 }
 0x632   :  { %2338 = vst.msk [vmem:[%s5082_s2 + $0xd] sm:$0x1] %vm410_vm3, %v2336_v55  ;;  %v2348_v22 = vrot.slane %v2336_v55, 7 }
 0x634   :  { %v2349_v56 = vsel %vm423_vm4, %v2348_v22, %v2335_v54 }
 0x635   :  { %3809 = vmatmul.mubr.msk.f32.vlgmr.msra.gmra.mrb[24].mxu0 %vm29_vm2, %v2349_v56  ;;  %3820 = vmatmul.mubr.msk.f32.vlgmr.msra.gmra.mrb[24].mxu1 %vm29_vm2, %v2349_v56 }
 0x636   :  { %4046 = vmatpush3.bf16.msra.mxu0 %v4856_v36  ;;  %4052 = vmatpush3.bf16.msra.mxu1 %v4858_v37 }
 0x637   :  { %4047 = vmatprep.subr.bf16.mxu0 %v4364_v3  ;;  %4053 = vmatprep.subr.bf16.mxu1 %v4364_v3 }
 0x638   :  { %3830 = vmatprep.mubr.msk.f32.mxu0 %vm4365_vm1, %v4366_v11  ;;  %3841 = vmatprep.mubr.msk.f32.mxu1 %vm4365_vm1, %v4366_v11 }
 0x63a   :  { %4049 = vmatpush3.bf16.msra.mxu0 %v4877_v43  ;;  %4055 = vmatpush3.bf16.msra.mxu1 %v4879_v44 }
 0x63b   :  { %4056 = vmatprep.subr.bf16.mxu0 %v4364_v3  ;;  %4062 = vmatprep.subr.bf16.mxu1 %v4364_v3 }
 0x63d   :  { %3831 = vmatmul.mubr.msk.f32.vlgmr.msra.gmra.mrb[26].mxu0 %vm29_vm2, %v2349_v56  ;;  %3842 = vmatmul.mubr.msk.f32.vlgmr.msra.gmra.mrb[26].mxu1 %vm29_vm2, %v2349_v56 }
 0x63e   :  { %4058 = vmatpush3.bf16.msra.mxu0 %v4773_v26  ;;  %4064 = vmatpush3.bf16.msra.mxu1 %v4784_v14  ;;  %v3316_v26 = vld [vmem:[%s5080_s0 + $0x18] sm:$0x1]  ;;  %v3321_v14 = vld [vmem:[%s5080_s0 + $0x19] sm:$0x1] }
 0x63f   :  { %4059 = vmatprep.subr.bf16.mxu0 %v4364_v3  ;;  %4065 = vmatprep.subr.bf16.mxu1 %v4364_v3 }
 0x640   :  { %3852 = vmatprep.mubr.msk.f32.mxu0 %vm4365_vm1, %v4366_v11  ;;  %3863 = vmatprep.mubr.msk.f32.mxu1 %vm4365_vm1, %v4366_v11 }
 0x642   :  { %4061 = vmatpush3.bf16.msra.mxu0 %v4793_v17  ;;  %4067 = vmatpush3.bf16.msra.mxu1 %v4797_v20  ;;  %v3322_v17 = vld [vmem:[%s5080_s0 + $0x39] sm:$0x1] }
 0x643   :  { %4068 = vmatprep.subr.bf16.mxu0 %v4364_v3  ;;  %4074 = vmatprep.subr.bf16.mxu1 %v4364_v3 }
 0x708   :  { %v2418_v60 = vpop.f32.mrb[24].mxu0  ;;  %v2512_v20 = vpop.f32.mrb[24].mxu1 }
 0x709   :  { %v2423_v61 = vrot.slane %v2418_v60, 1  ;;  %v2426_v62 = vadd.f32 %v3316_v26, %v2418_v60  ;;  %v2517_v45 = vrot.slane %v2512_v20, 1  ;;  %v2520_v63 = vadd.f32 %v3321_v14, %v2512_v20  ;;  %v3810_v46 = vpop.f32.mrb[25].mxu0  ;;  %v3821_v0 = vpop.f32.mrb[25].mxu1 }
 0x70b   :  { %v2427_v1 = vadd.f32 %v3317_v59, %v2423_v61  ;;  %v3319_v2 = vmul.f32 -1.442695, %v2426_v62  ;;  %v2521_v12 = vadd.f32 %v3322_v17, %v2517_v45  ;;  %v3328_v13 = vmul.f32 -1.442695, %v2520_v63 }
 0x70d   :  { %4276 = vpow2.f32 %v3319_v2  ;;  %v3320_v57 = vmul.f32 -1.442695, %v2427_v1  ;;  %v3329_v5 = vmul.f32 -1.442695, %v2521_v12 }
 0x70e   :  { %4278 = vpow2.f32 %v3328_v13 }
 0x70f   :  { %4280 = vpow2.f32 %v3320_v57 }
 0x710   :  { %4282 = vpow2.f32 %v3329_v5  ;;  %v2606_v19 = vpop.f32.mrb[26].mxu0  ;;  %v2690_v7 = vpop.f32.mrb[26].mxu1 }
 0x711   :  { %v2611_v9 = vrot.slane %v2606_v19, 1  ;;  %v2695_v10 = vrot.slane %v2690_v7, 1  ;;  %v2698_v15 = vadd.f32 %v3337_v58, %v2690_v7  ;;  %v3832_v16 = vpop.f32.mrb[27].mxu0  ;;  %v3843_v23 = vpop.f32.mrb[27].mxu1  ;;  %v2614_v24 = vadd.f32 %v3330_v6, %v2606_v19  ;;  %v3360_v19 = vld [vmem:[%s5080_s0 + $0x1e] sm:$0x1] }
 0x713   :  { %v2615_v27 = vadd.f32 %v3331_v18, %v2611_v9  ;;  %v2699_v28 = vadd.f32 %v3338_v25, %v2695_v10  ;;  %v3344_v4 = vmul.f32 -1.442695, %v2698_v15  ;;  %4284 = vtanh.f32 %v2614_v24  ;;  %v3367_v18 = vld [vmem:[%s5080_s0 + $0x1f] sm:$0x1]  ;;  %v3361_v25 = vld [vmem:[%s5080_s0 + $0x3e] sm:$0x1] }
 0x714   :  { %v3368_v9 = vld [vmem:[%s5080_s0 + $0x3f] sm:$0x1] }
 0x715   :  { %v3345_v29 = vmul.f32 -1.442695, %v2699_v28  ;;  %4286 = vtanh.f32 %v2615_v27 }
 0x716   :  { %4288 = vpow2.f32 %v3344_v4 }
 0x717   :  { %v4277_v8 = vpop.eup %4276  ;;  %4290 = vpow2.f32 %v3345_v29 }
 0x718   :  { %v4279_v30 = vpop.eup %4278  ;;  %v2434_v33 = vadd.f32 1.0, %v4277_v8 }
 0x719   :  { %v4281_v34 = vpop.eup %4280  ;;  %v2528_v35 = vadd.f32 1.0, %v4279_v30 }
 0x71a   :  { %v4283_v38 = vpop.eup %4282  ;;  %v2435_v39 = vadd.f32 1.0, %v4281_v34  ;;  %4292 = vrcp.f32 %v2434_v33 }
 0x71b   :  { %v2529_v40 = vadd.f32 1.0, %v4283_v38  ;;  %4294 = vrcp.f32 %v2528_v35 }
 0x71c   :  { %4296 = vrcp.f32 %v2435_v39 }
 0x71d   :  { %4298 = vrcp.f32 %v2529_v40  ;;  %v4285_v41 = vpop.eup %4284 }
 0x71f   :  { %v4287_v42 = vpop.eup %4286 }
 0x720   :  { %v4289_v47 = vpop.eup %4288 }
 0x721   :  { %v4291_v48 = vpop.eup %4290  ;;  %v2706_v52 = vadd.f32 1.0, %v4289_v47 }
 0x722   :  { %v2707_v22 = vadd.f32 1.0, %v4291_v48 }
 0x723   :  { %4300 = vrcp.f32 %v2706_v52 }
 0x724   :  { %v4293_v49 = vpop.eup %4292 }
 0x725   :  { %v4295_v50 = vpop.eup %4294  ;;  %v2714_v32 = vmul.f32 %v4293_v49, %v4285_v41 }
 0x726   :  { %v4297_v53 = vpop.eup %4296  ;;  %v2712_v54 = vmul.f32 %v4295_v50, %v4931_v31 }
 0x727   :  { %v4299_v21 = vpop.eup %4298  ;;  %v2715_v55 = vmul.f32 %v4297_v53, %v4287_v42 }
 0x728   :  { %v2713_v56 = vmul.f32 %v4299_v21, %v4933_v51  ;;  %v5000_v26 = vadd.f32 %v2714_v32, %v2712_v54 }
 0x72a   :  { %v5002_v14 = vadd.f32 %v2715_v55, %v2713_v56  ;;  %4302 = vtanh.f32 %v5000_v26 }
 0x72b   :  { %4304 = vrcp.f32 %v2707_v22 }
 0x72c   :  { %4306 = vtanh.f32 %v5002_v14 }
 0x72d   :  { %v4301_v59 = vpop.eup %4300 }
 0x734   :  { %v4303_v60 = vpop.eup %4302 }
 0x735   :  { %v4305_v17 = vpop.eup %4304  ;;  %v2720_v20 = vmul.f32 %v4303_v60, %v4301_v59 }
 0x736   :  { %v4307_v31 = vpop.eup %4306 }
 0x737   :  { %v2721_v61 = vmul.f32 %v4307_v31, %v4305_v17  ;;  %2722 = vst.msk [vmem:[%s5082_s2 + $0x6] sm:$0x1] %vm410_vm3, %v2720_v20 }
 0x739   :  { %2723 = vst.msk [vmem:[%s5082_s2 + $0xe] sm:$0x1] %vm410_vm3, %v2721_v61  ;;  %v2733_v51 = vrot.slane %v2721_v61, 7 }
 0x73b   :  { %v2734_v62 = vsel %vm423_vm4, %v2733_v51, %v2720_v20 }
 0x73c   :  { %3853 = vmatmul.mubr.msk.f32.vlgmr.msra.gmra.mrb[28].mxu0 %vm29_vm2, %v2734_v62  ;;  %3864 = vmatmul.mubr.msk.f32.vlgmr.msra.gmra.mrb[28].mxu1 %vm29_vm2, %v2734_v62 }
 0x73d   :  { %4070 = vmatpush3.bf16.msra.mxu0 %v4856_v36  ;;  %4076 = vmatpush3.bf16.msra.mxu1 %v4858_v37  ;;  %v3346_v36 = vld [vmem:[%s5080_s0 + $0x1c] sm:$0x1] }
 0x73e   :  { %4071 = vmatprep.subr.bf16.mxu0 %v4364_v3  ;;  %4077 = vmatprep.subr.bf16.mxu1 %v4364_v3  ;;  %v3351_v3 = vld [vmem:[%s5080_s0 + $0x1d] sm:$0x1] }
 0x73f   :  { %3874 = vmatprep.mubr.msk.f32.mxu0 %vm4365_vm1, %v4366_v11  ;;  %3885 = vmatprep.mubr.msk.f32.mxu1 %vm4365_vm1, %v4366_v11  ;;  %v3347_v11 = vld [vmem:[%s5080_s0 + $0x3c] sm:$0x1] }
 0x741   :  { %4073 = vmatpush3.bf16.msra.mxu0 %v4877_v43  ;;  %4079 = vmatpush3.bf16.msra.mxu1 %v4879_v44  ;;  %v3352_v43 = vld [vmem:[%s5080_s0 + $0x3d] sm:$0x1]  ;;  %s4367_s0 = smov [#allocation4]  }
 0x742   :  { %s3134_s1 = sshll.u32 %s4367_s0, 4  ;;  %s3135_s1 = int_to_ptr.vmem [resolvable:$true] %s3134_s1 }
 0x743   :  { %s4340_s14 = scalar_lea.vmem %s3135_s1, 32  ;;  %p4345_p1 = scmp.lt.s32.totalorder %s3135_s1, %s3135_s1 }
 0x744   :  { %3875 = vmatmul.mubr.msk.f32.vlgmr.msra.gmra.mrb[30].mxu0 %vm29_vm2, %v2734_v62  ;;  %3886 = vmatmul.mubr.msk.f32.vlgmr.msra.gmra.mrb[30].mxu1 %vm29_vm2, %v2734_v62  ;;  %p4341_p0 = scmp.ne.s32.totalorder %s3135_s1, %s4340_s14  ;;  %p4346_p2 = scmp.lt.s32.totalorder %s4340_s14, %s4340_s14 }
 0x746   :  { %p4347_p3 = por %p4346_p2, %p4345_p1 }
 0x748   :  { %p4348_p4 = pnand %p4347_p3, %p4341_p0 }
 0x80f   :  { %v2803_v37 = vpop.f32.mrb[28].mxu0  ;;  %v2897_v44 = vpop.f32.mrb[28].mxu1 }
 0x810   :  { %v2808_v45 = vrot.slane %v2803_v37, 1  ;;  %v2811_v63 = vadd.f32 %v3346_v36, %v2803_v37  ;;  %v2902_v46 = vrot.slane %v2897_v44, 1  ;;  %v2905_v0 = vadd.f32 %v3351_v3, %v2897_v44  ;;  %v3854_v1 = vpop.f32.mrb[29].mxu0  ;;  %v3865_v2 = vpop.f32.mrb[29].mxu1 }
 0x812   :  { %v2812_v12 = vadd.f32 %v3347_v11, %v2808_v45  ;;  %v3349_v13 = vmul.f32 -1.442695, %v2811_v63  ;;  %v2906_v57 = vadd.f32 %v3352_v43, %v2902_v46  ;;  %v3358_v5 = vmul.f32 -1.442695, %v2905_v0 }
 0x814   :  { %4308 = vpow2.f32 %v3349_v13  ;;  %v3350_v58 = vmul.f32 -1.442695, %v2812_v12  ;;  %v3359_v6 = vmul.f32 -1.442695, %v2906_v57 }
 0x815   :  { %4310 = vpow2.f32 %v3358_v5 }
 0x816   :  { %4312 = vpow2.f32 %v3350_v58 }
 0x817   :  { %4314 = vpow2.f32 %v3359_v6  ;;  %v2991_v7 = vpop.f32.mrb[30].mxu0  ;;  %v3075_v10 = vpop.f32.mrb[30].mxu1 }
 0x818   :  { %v2996_v15 = vrot.slane %v2991_v7, 1  ;;  %v3080_v16 = vrot.slane %v3075_v10, 1  ;;  %v3083_v23 = vadd.f32 %v3367_v18, %v3075_v10  ;;  %v3876_v24 = vpop.f32.mrb[31].mxu0  ;;  %v3887_v27 = vpop.f32.mrb[31].mxu1  ;;  %v2999_v28 = vadd.f32 %v3360_v19, %v2991_v7 }
 0x81a   :  { %v3000_v4 = vadd.f32 %v3361_v25, %v2996_v15  ;;  %v3084_v29 = vadd.f32 %v3368_v9, %v3080_v16  ;;  %v3374_v8 = vmul.f32 -1.442695, %v3083_v23  ;;  %4316 = vtanh.f32 %v2999_v28 }
 0x81c   :  { %v3375_v30 = vmul.f32 -1.442695, %v3084_v29  ;;  %4318 = vtanh.f32 %v3000_v4 }
 0x81d   :  { %4320 = vpow2.f32 %v3374_v8 }
 0x81e   :  { %v4309_v33 = vpop.eup %4308  ;;  %4322 = vpow2.f32 %v3375_v30 }
 0x81f   :  { %v4311_v34 = vpop.eup %4310  ;;  %v2819_v35 = vadd.f32 1.0, %v4309_v33 }
 0x820   :  { %v4313_v38 = vpop.eup %4312  ;;  %v2913_v39 = vadd.f32 1.0, %v4311_v34 }
 0x821   :  { %v4315_v40 = vpop.eup %4314  ;;  %v2820_v41 = vadd.f32 1.0, %v4313_v38  ;;  %4324 = vrcp.f32 %v2819_v35 }
 0x822   :  { %v2914_v42 = vadd.f32 1.0, %v4315_v40  ;;  %4326 = vrcp.f32 %v2913_v39 }
 0x823   :  { %4328 = vrcp.f32 %v2820_v41 }
 0x824   :  { %4330 = vrcp.f32 %v2914_v42  ;;  %v4317_v47 = vpop.eup %4316 }
 0x826   :  { %v4319_v48 = vpop.eup %4318 }
 0x827   :  { %v4321_v49 = vpop.eup %4320 }
 0x828   :  { %v4323_v50 = vpop.eup %4322  ;;  %v3091_v53 = vadd.f32 1.0, %v4321_v49 }
 0x829   :  { %v3092_v56 = vadd.f32 1.0, %v4323_v50 }
 0x82a   :  { %4332 = vrcp.f32 %v3091_v53 }
 0x82b   :  { %v4325_v32 = vpop.eup %4324 }
 0x82c   :  { %v4327_v52 = vpop.eup %4326  ;;  %v3099_v54 = vmul.f32 %v4325_v32, %v4317_v47 }
 0x82d   :  { %v4329_v21 = vpop.eup %4328  ;;  %v3097_v55 = vmul.f32 %v4327_v52, %v5000_v26 }
 0x82e   :  { %v4331_v22 = vpop.eup %4330  ;;  %v3100_v59 = vmul.f32 %v4329_v21, %v4319_v48 }
 0x82f   :  { %v3098_v60 = vmul.f32 %v4331_v22, %v5002_v14  ;;  %v3101_v17 = vadd.f32 %v3099_v54, %v3097_v55 }
 0x831   :  { %v3102_v20 = vadd.f32 %v3100_v59, %v3098_v60  ;;  %4334 = vtanh.f32 %v3101_v17 }
 0x832   :  { %4336 = vrcp.f32 %v3092_v56 }
 0x833   :  { %4338 = vtanh.f32 %v3102_v20  ;;  %v3118_v31 = vrot.slane %v3102_v20, 7 }
 0x835   :  { %v3119_v61 = vsel %vm423_vm4, %v3118_v31, %v3101_v17 }
 0x836   :  { %3121 = vst.msk [vmem:[#allocation3] sm:$0x3] %vm18_vm0, %v3119_v61  ;;  %3125 = vst.msk [vmem:[#allocation4] sm:$0x3] %vm18_vm0, %v3119_v61 }
 0x837   :  { %4351 = shalt.err (!%p4348_p4)
}
 0x838   :  { %s4352_s17 = scalar_lea.hbm %s5083_s3, 32 }
 0x839   :  { %p4353_p5 = scmp.ne.s32.totalorder %s5083_s3, %s4352_s17  ;;  %p4356_p6 = scmp.lt.u32.totalorder %s4352_s17, %s5083_s3 }
 0x83b   :  { %p4358_p7 = pnand %p4356_p6, %p4353_p5 }
 0x83d   :  { %4361 = shalt.err (!%p4358_p7)
}
 0x83e   :  { %3137 = dma.vmem_to_hbm [thread:$0]  %s3135_s1, 32, %s5083_s3, [#allocation5]   ;;  %v4333_v26 = vpop.eup %4332 }
 0x83f   :  { %v4335_v14 = vpop.eup %4334 }
 0x840   :  { %v4337_v51 = vpop.eup %4336  ;;  %v3105_v62 = vmul.f32 %v4335_v14, %v4333_v26 }
 0x841   :  { %v4339_v36 = vpop.eup %4338 }
 0x842   :  { %v3106_v3 = vmul.f32 %v4339_v36, %v4337_v51  ;;  %3107 = vst.msk [vmem:[%s5082_s2 + $0x7] sm:$0x1] %vm410_vm3, %v3105_v62 }
 0x844   :  { %3108 = vst.msk [vmem:[%s5082_s2 + $0xf] sm:$0x1] %vm410_vm3, %v3106_v3  ;;  %v3111_v11 = vrot.slane %v3106_v3, 7 }
 0x846   :  { %v3112_v37 = vsel %vm423_vm4, %v3111_v11, %v3105_v62 }
 0x847   :  { %3115 = vst.msk [vmem:[#allocation2] sm:$0x3] %vm18_vm0, %v3112_v37 }
 0x848   :  { %4362 = dma.done.wait [#allocation5], 32  }
 0x849   :  { %4363 = vsyncadd [#allocation5], 4294967264 }
 0x84a   :  { %3143 = vsyncpa [#allocation5], 1 }

</bundles_post_ra>
